<compile_context>
chip_gen: v7x
topology: tpu7x:2x2x1
jax: 0.10.0
libtpu: 0.0.40
codegen_flags: <defaults>
</compile_context>

<pallas_src>
import functools

import jax
import jax.numpy as jnp
from jax.experimental import pallas as pl
from jax.experimental.pallas import tpu as pltpu


LN_EPS = 1e-5      # torch.nn.LayerNorm default
NEG_INF = -1e9     # matches reference masked_fill(mask == 0, -1e9)


# -----------------------------------------------------------------------------
# In-kernel building blocks (values already resident in VMEM)
# -----------------------------------------------------------------------------
def _layer_norm(x, g, b, eps):
    # Single-pass LN: var = E[x^2] - mu^2 (halves the lane reductions).
    mu = jnp.mean(x, axis=-1, keepdims=True)
    ms = jnp.mean(x * x, axis=-1, keepdims=True)
    var = jnp.maximum(ms - mu * mu, 0.0)
    return (x - mu) * jax.lax.rsqrt(var + eps) * g + b


def _mha_block(x, bias, wqkv, bqkv, wo, bo, ln_g, ln_b, *, n_head, d_k, d_v, eps):
    """Post-LN multi-head self-attention sublayer for one batch element.

    x: (S, D) f32, bias: (S, S) additive mask bias (0 / -1e9),
    wqkv: (D, H*(2*dk+dv)) bf16 [Q|K|V], wo: (H*dv, D) bf16.
    """
    S, D = x.shape
    hdk = n_head * d_k
    scale = 1.0 / (d_k ** 0.5)

    # Fused QKV projection: bf16 operands, f32 accumulation.
    qkv = jnp.dot(x.astype(jnp.bfloat16), wqkv,
                  preferred_element_type=jnp.float32) + bqkv      # (S, H*(2dk+dv))
    qkv_b = qkv.astype(jnp.bfloat16)

    heads = []
    for h in range(n_head):  # static unroll; n_head is small
        qh = qkv_b[:, h * d_k:(h + 1) * d_k]                       # (S, dk)
        kh = qkv_b[:, hdk + h * d_k: hdk + (h + 1) * d_k]          # (S, dk)
        vh = qkv_b[:, 2 * hdk + h * d_v: 2 * hdk + (h + 1) * d_v]  # (S, dv)

        # q @ k.T via dot_general (contract last dims; no XLU transpose).
        s = jax.lax.dot_general(qh, kh, (((1,), (1,)), ((), ())),
                                preferred_element_type=jnp.float32)
        s = s * scale + bias                       # hoisted additive mask bias
        s = s - jnp.max(s, axis=-1, keepdims=True)
        p = jnp.exp(s)
        p = p * pl.reciprocal(jnp.sum(p, axis=-1, keepdims=True), approx=True)
        heads.append(jnp.dot(p.astype(jnp.bfloat16), vh,
                             preferred_element_type=jnp.float32))  # (S, dv)

    # Concatenate heads; ONE dense output projection (contraction K = H*dv).
    o = jnp.concatenate(heads, axis=-1)                            # (S, H*dv)
    out = jnp.dot(o.astype(jnp.bfloat16), wo,
                  preferred_element_type=jnp.float32) + bo
    return _layer_norm(out + x, ln_g, ln_b, eps)


def _ffn_block(x, w1, b1, w2, b2, ln_g, ln_b, *, eps):
    h = jnp.dot(x.astype(jnp.bfloat16), w1,
                preferred_element_type=jnp.float32) + b1
    h = jnp.maximum(h, 0.0)
    y = jnp.dot(h.astype(jnp.bfloat16), w2,
                preferred_element_type=jnp.float32) + b2
    return _layer_norm(y + x, ln_g, ln_b, eps)


# -----------------------------------------------------------------------------
# One fused EncoderLayer kernel (global MHA + category MHA + FFN, all in VMEM)
# -----------------------------------------------------------------------------
def _encoder_layer_kernel(
        x_ref, gmask_ref, cmask_ref,
        g_wqkv, g_bqkv, g_wo, g_bo, g_lng, g_lnb,
        c_wqkv, c_bqkv, c_wo, c_bo, c_lng, c_lnb,
        f_w1, f_b1, f_w2, f_b2, f_lng, f_lnb,
        o_ref, *, n_head, d_k, d_v, eps):
    x = x_ref[0].astype(jnp.float32)                              # (S, D)

    # int8 {0,1} masks -> additive biases, computed once per sublayer (hoisted
    # out of the per-head loop; a {0,1} mask is assumed, matching the module).
    g_bias = jnp.where(gmask_ref[0].astype(jnp.float32) > 0.0, 0.0, NEG_INF)
    c_bias = jnp.where(cmask_ref[0].astype(jnp.float32) > 0.0, 0.0, NEG_INF)

    x = _mha_block(x, g_bias, g_wqkv[...], g_bqkv[...], g_wo[...], g_bo[...],
                   g_lng[...], g_lnb[...],
                   n_head=n_head, d_k=d_k, d_v=d_v, eps=eps)
    x = _mha_block(x, c_bias, c_wqkv[...], c_bqkv[...], c_wo[...], c_bo[...],
                   c_lng[...], c_lnb[...],
                   n_head=n_head, d_k=d_k, d_v=d_v, eps=eps)
    x = _ffn_block(x, f_w1[...], f_b1[...], f_w2[...], f_b2[...],
                   f_lng[...], f_lnb[...], eps=eps)

    o_ref[0] = x.astype(o_ref.dtype)


# -----------------------------------------------------------------------------
# Wrappers
# -----------------------------------------------------------------------------
def _whole_spec(shape):
    """Whole-array block that stays resident across the batch grid."""
    n = len(shape)
    return pl.BlockSpec(shape, lambda b: (0,) * n)


def _mha_flat(p):
    return [p["wqkv"], p["bqkv"].reshape(1, -1), p["wo"],
            p["bo"].reshape(1, -1), p["ln_g"].reshape(1, -1),
            p["ln_b"].reshape(1, -1)]


def _ffn_flat(p):
    return [p["w1"], p["b1"].reshape(1, -1), p["w2"],
            p["b2"].reshape(1, -1), p["ln_g"].reshape(1, -1),
            p["ln_b"].reshape(1, -1)]


def encoder_layer(layer_p, x, global_mask, category_mask, *, n_head, d_k, d_v,
                  eps=LN_EPS):
    B, S, D = x.shape
    weights = (_mha_flat(layer_p["global_attn"])
               + _mha_flat(layer_p["category_attn"])
               + _ffn_flat(layer_p["ffn"]))

    in_specs = [
        pl.BlockSpec((1, S, D), lambda b: (b, 0, 0)),
        pl.BlockSpec((1, S, S), lambda b: (b, 0, 0)),
        pl.BlockSpec((1, S, S), lambda b: (b, 0, 0)),
    ] + [_whole_spec(w.shape) for w in weights]

    kernel = functools.partial(_encoder_layer_kernel,
                               n_head=n_head, d_k=d_k, d_v=d_v, eps=eps)
    return pl.pallas_call(
        kernel,
        out_shape=jax.ShapeDtypeStruct((B, S, D), x.dtype),
        grid_spec=pltpu.PrefetchScalarGridSpec(
            num_scalar_prefetch=0,
            grid=(B,),
            in_specs=in_specs,
            out_specs=pl.BlockSpec((1, S, D), lambda b: (b, 0, 0)),
        ),
        # Activation buffer is reused in place across layer calls.
        input_output_aliases={0: 0},
        compiler_params=pltpu.CompilerParams(
            dimension_semantics=("parallel",),   # batch splits across v7x's 2 TCs
            vmem_limit_bytes=64 * 1024 * 1024,
        ),
    )(x, global_mask, category_mask, *weights)


def transformer_encoder(params, enc_input, global_mask, category_mask, *,
                        n_head, d_k, d_v):
    # TODO(synk): nn.Dropout is identity in eval mode; training-time dropout is
    # not implemented.
    # Ship masks as int8 {0,1}: 4x less mask DMA per layer, converted once.
    gmask_i8 = (global_mask > 0).astype(jnp.int8)
    cmask_i8 = (category_mask > 0).astype(jnp.int8)
    x = enc_input
    for layer_p in params["layers"]:
        x = encoder_layer(layer_p, x, gmask_i8, cmask_i8,
                          n_head=n_head, d_k=d_k, d_v=d_v)
    return x


# -----------------------------------------------------------------------------
# Deterministic parameter init (Q/K/V weights pre-concatenated, bf16 matrices)
# -----------------------------------------------------------------------------
def init_mha_params(key, d_model, n_head, d_k, d_v):
    k1, k2 = jax.random.split(key)
    qkv_dim = n_head * (2 * d_k + d_v)
    return {
        "wqkv": (0.02 * jax.random.normal(k1, (d_model, qkv_dim), jnp.float32)
                 ).astype(jnp.bfloat16),
        "bqkv": jnp.zeros((qkv_dim,), jnp.float32),
        "wo": (0.02 * jax.random.normal(k2, (n_head * d_v, d_model), jnp.float32)
               ).astype(jnp.bfloat16),
        "bo": jnp.zeros((d_model,), jnp.float32),
        "ln_g": jnp.ones((d_model,), jnp.float32),
        "ln_b": jnp.zeros((d_model,), jnp.float32),
    }


def init_ffn_params(key, d_model, d_inner):
    k1, k2 = jax.random.split(key)
    return {
        "w1": (0.02 * jax.random.normal(k1, (d_model, d_inner), jnp.float32)
               ).astype(jnp.bfloat16),
        "b1": jnp.zeros((d_inner,), jnp.float32),
        "w2": (0.02 * jax.random.normal(k2, (d_inner, d_model), jnp.float32)
               ).astype(jnp.bfloat16),
        "b2": jnp.zeros((d_model,), jnp.float32),
        "ln_g": jnp.ones((d_model,), jnp.float32),
        "ln_b": jnp.zeros((d_model,), jnp.float32),
    }


def init_params(key, n_layer, n_head, d_model, d_inner, d_k, d_v):
    layers = []
    for _ in range(n_layer):
        key, k1, k2, k3 = jax.random.split(key, 4)
        layers.append({
            "global_attn": init_mha_params(k1, d_model, n_head, d_k, d_v),
            "category_attn": init_mha_params(k2, d_model, n_head, d_k, d_v),
            "ffn": init_ffn_params(k3, d_model, d_inner),
        })
    return {"layers": layers}


# -----------------------------------------------------------------------------
# Pure-JAX reference (same bf16 weights, f32 activation math) for correctness
# -----------------------------------------------------------------------------
def _ref_layer_norm(x, g, b, eps=LN_EPS):
    mu = x.mean(-1, keepdims=True)
    var = ((x - mu) ** 2).mean(-1, keepdims=True)
    return (x - mu) / jnp.sqrt(var + eps) * g + b


def _ref_mha(p, x, mask, n_head, d_k, d_v):
    B, S, D = x.shape
    hdk = n_head * d_k
    qkv = x @ p["wqkv"].astype(jnp.float32) + p["bqkv"]
    q = qkv[..., :hdk].reshape(B, S, n_head, d_k)
    k = qkv[..., hdk:2 * hdk].reshape(B, S, n_head, d_k)
    v = qkv[..., 2 * hdk:].reshape(B, S, n_head, d_v)
    s = jnp.einsum("bqhd,bkhd->bhqk", q, k) / (d_k ** 0.5)
    s = jnp.where(mask[:, None] > 0, s, NEG_INF)
    a = jax.nn.softmax(s, axis=-1)
    o = jnp.einsum("bhqk,bkhd->bqhd", a, v).reshape(B, S, n_head * d_v)
    o = o @ p["wo"].astype(jnp.float32) + p["bo"]
    return _ref_layer_norm(o + x, p["ln_g"], p["ln_b"])


def _ref_ffn(p, x):
    h = jnp.maximum(x @ p["w1"].astype(jnp.float32) + p["b1"], 0.0)
    y = h @ p["w2"].astype(jnp.float32) + p["b2"]
    return _ref_layer_norm(y + x, p["ln_g"], p["ln_b"])


def reference_encoder(params, x, gmask, cmask, n_head, d_k, d_v):
    for lp in params["layers"]:
        x = _ref_mha(lp["global_attn"], x, gmask, n_head, d_k, d_v)
        x = _ref_mha(lp["category_attn"], x, cmask, n_head, d_k, d_v)
        x = _ref_ffn(lp["ffn"], x)
    return x


# -----------------------------------------------------------------------------
# Main
# -----------------------------------------------------------------------------
if __name__ == "__main__":
    n_layer, n_head, d_model, d_inner = 2, 4, 32, 64
    d_k = d_v = d_model // n_head
    B, S = 2, 8

    root = jax.random.PRNGKey(0)
    k_params, k_input = jax.random.split(root)
    params = init_params(k_params, n_layer, n_head, d_model, d_inner, d_k, d_v)
    enc_input = jax.random.normal(k_input, (B, S, d_model), jnp.float32)

    # global mask: attend everywhere; category mask: attend within 4-token groups.
    global_mask = jnp.ones((B, S, S), jnp.float32)
    cats = jnp.arange(S) // 4
    category_mask = jnp.broadcast_to(
        (cats[:, None] == cats[None, :]).astype(jnp.float32), (B, S, S))

    fwd = jax.jit(functools.partial(transformer_encoder,
                                    n_head=n_head, d_k=d_k, d_v=d_v))
    out = jax.block_until_ready(fwd(params, enc_input, global_mask, category_mask))

    assert out.shape == (B, S, d_model)
    assert bool(jnp.all(jnp.isfinite(out)))

    ref = reference_encoder(params, enc_input, global_mask, category_mask,
                            n_head, d_k, d_v)
    # Tolerance covers bf16 matmul operands + approx-reciprocal softmax denom.
    max_err = float(jnp.max(jnp.abs(out - ref)))
    assert max_err < 5e-2, f"kernel/reference mismatch: {max_err}"
    print("KERNEL_OK")
</pallas_src>

<mosaic_0001>
module attributes {stable_mosaic.version = 11 : i64} {
  func.func @_encoder_layer_kernel(%arg0: i32, %arg1: memref<1x8x32xf32, #tpu.memory_space<vmem>>, %arg2: memref<1x8x8xi8, #tpu.memory_space<vmem>>, %arg3: memref<1x8x8xi8, #tpu.memory_space<vmem>>, %arg4: memref<32x96xbf16, #tpu.memory_space<vmem>>, %arg5: memref<1x96xf32, #tpu.memory_space<vmem>>, %arg6: memref<32x32xbf16, #tpu.memory_space<vmem>>, %arg7: memref<1x32xf32, #tpu.memory_space<vmem>>, %arg8: memref<1x32xf32, #tpu.memory_space<vmem>>, %arg9: memref<1x32xf32, #tpu.memory_space<vmem>>, %arg10: memref<32x96xbf16, #tpu.memory_space<vmem>>, %arg11: memref<1x96xf32, #tpu.memory_space<vmem>>, %arg12: memref<32x32xbf16, #tpu.memory_space<vmem>>, %arg13: memref<1x32xf32, #tpu.memory_space<vmem>>, %arg14: memref<1x32xf32, #tpu.memory_space<vmem>>, %arg15: memref<1x32xf32, #tpu.memory_space<vmem>>, %arg16: memref<32x64xbf16, #tpu.memory_space<vmem>>, %arg17: memref<1x64xf32, #tpu.memory_space<vmem>>, %arg18: memref<64x32xbf16, #tpu.memory_space<vmem>>, %arg19: memref<1x32xf32, #tpu.memory_space<vmem>>, %arg20: memref<1x32xf32, #tpu.memory_space<vmem>>, %arg21: memref<1x32xf32, #tpu.memory_space<vmem>>, %arg22: memref<1x8x32xf32, #tpu.memory_space<vmem>>) attributes {dimension_semantics = [#tpu.dimension_semantics<parallel>], iteration_bounds = array<i64: 2>, scalar_prefetch = 0 : i64, scratch_operands = 0 : i64, tpu.core_type = #tpu.core_type<tc>, window_params = [{transform_indices = @transform_0, window_bounds = array<i64: 1, 8, 32>}, {transform_indices = @transform_1, window_bounds = array<i64: 1, 8, 8>}, {transform_indices = @transform_2, window_bounds = array<i64: 1, 8, 8>}, {pipeline_mode = #tpu.pipeline_mode<synchronous>, transform_indices = @transform_3, window_bounds = array<i64: 32, 96>}, {pipeline_mode = #tpu.pipeline_mode<synchronous>, transform_indices = @transform_4, window_bounds = array<i64: 1, 96>}, {pipeline_mode = #tpu.pipeline_mode<synchronous>, transform_indices = @transform_5, window_bounds = array<i64: 32, 32>}, {pipeline_mode = #tpu.pipeline_mode<synchronous>, transform_indices = @transform_6, window_bounds = array<i64: 1, 32>}, {pipeline_mode = #tpu.pipeline_mode<synchronous>, transform_indices = @transform_7, window_bounds = array<i64: 1, 32>}, {pipeline_mode = #tpu.pipeline_mode<synchronous>, transform_indices = @transform_8, window_bounds = array<i64: 1, 32>}, {pipeline_mode = #tpu.pipeline_mode<synchronous>, transform_indices = @transform_9, window_bounds = array<i64: 32, 96>}, {pipeline_mode = #tpu.pipeline_mode<synchronous>, transform_indices = @transform_10, window_bounds = array<i64: 1, 96>}, {pipeline_mode = #tpu.pipeline_mode<synchronous>, transform_indices = @transform_11, window_bounds = array<i64: 32, 32>}, {pipeline_mode = #tpu.pipeline_mode<synchronous>, transform_indices = @transform_12, window_bounds = array<i64: 1, 32>}, {pipeline_mode = #tpu.pipeline_mode<synchronous>, transform_indices = @transform_13, window_bounds = array<i64: 1, 32>}, {pipeline_mode = #tpu.pipeline_mode<synchronous>, transform_indices = @transform_14, window_bounds = array<i64: 1, 32>}, {pipeline_mode = #tpu.pipeline_mode<synchronous>, transform_indices = @transform_15, window_bounds = array<i64: 32, 64>}, {pipeline_mode = #tpu.pipeline_mode<synchronous>, transform_indices = @transform_16, window_bounds = array<i64: 1, 64>}, {pipeline_mode = #tpu.pipeline_mode<synchronous>, transform_indices = @transform_17, window_bounds = array<i64: 64, 32>}, {pipeline_mode = #tpu.pipeline_mode<synchronous>, transform_indices = @transform_18, window_bounds = array<i64: 1, 32>}, {pipeline_mode = #tpu.pipeline_mode<synchronous>, transform_indices = @transform_19, window_bounds = array<i64: 1, 32>}, {pipeline_mode = #tpu.pipeline_mode<synchronous>, transform_indices = @transform_20, window_bounds = array<i64: 1, 32>}, {transform_indices = @transform_21, window_bounds = array<i64: 1, 8, 32>}]} {
    %c0 = arith.constant 0 : index
    %c0_0 = arith.constant 0 : index
    %c0_1 = arith.constant 0 : index
    %0 = vector.load %arg1[%c0, %c0_0, %c0_1] : memref<1x8x32xf32, #tpu.memory_space<vmem>>, vector<1x8x32xf32>
    %1 = vector.shape_cast %0 : vector<1x8x32xf32> to vector<8x32xf32>
    %c0_2 = arith.constant 0 : index
    %c0_3 = arith.constant 0 : index
    %c0_4 = arith.constant 0 : index
    %2 = vector.load %arg2[%c0_2, %c0_3, %c0_4] : memref<1x8x8xi8, #tpu.memory_space<vmem>>, vector<1x8x8xi8>
    %3 = vector.shape_cast %2 : vector<1x8x8xi8> to vector<8x8xi8>
    %4 = arith.sitofp %3 : vector<8x8xi8> to vector<8x8xf32>
    %cst = arith.constant 0.000000e+00 : f32
    %5 = vector.broadcast %cst : f32 to vector<8x8xf32>
    %6 = arith.cmpf ogt, %4, %5 : vector<8x8xf32>
    %cst_5 = arith.constant 0.000000e+00 : f32
    %cst_6 = arith.constant -1.000000e+09 : f32
    %7 = vector.broadcast %cst_5 : f32 to vector<8x8xf32>
    %8 = vector.broadcast %cst_6 : f32 to vector<8x8xf32>
    %9 = arith.select %6, %7, %8 : vector<8x8xi1>, vector<8x8xf32>
    %c0_7 = arith.constant 0 : index
    %c0_8 = arith.constant 0 : index
    %c0_9 = arith.constant 0 : index
    %10 = vector.load %arg3[%c0_7, %c0_8, %c0_9] : memref<1x8x8xi8, #tpu.memory_space<vmem>>, vector<1x8x8xi8>
    %11 = vector.shape_cast %10 : vector<1x8x8xi8> to vector<8x8xi8>
    %12 = arith.sitofp %11 : vector<8x8xi8> to vector<8x8xf32>
    %cst_10 = arith.constant 0.000000e+00 : f32
    %13 = vector.broadcast %cst_10 : f32 to vector<8x8xf32>
    %14 = arith.cmpf ogt, %12, %13 : vector<8x8xf32>
    %cst_11 = arith.constant 0.000000e+00 : f32
    %cst_12 = arith.constant -1.000000e+09 : f32
    %15 = vector.broadcast %cst_11 : f32 to vector<8x8xf32>
    %16 = vector.broadcast %cst_12 : f32 to vector<8x8xf32>
    %17 = arith.select %14, %15, %16 : vector<8x8xi1>, vector<8x8xf32>
    %c0_13 = arith.constant 0 : index
    %c0_14 = arith.constant 0 : index
    %18 = vector.load %arg4[%c0_13, %c0_14] : memref<32x96xbf16, #tpu.memory_space<vmem>>, vector<32x96xbf16>
    %c0_15 = arith.constant 0 : index
    %c0_16 = arith.constant 0 : index
    %19 = vector.load %arg5[%c0_15, %c0_16] : memref<1x96xf32, #tpu.memory_space<vmem>>, vector<1x96xf32>
    %c0_17 = arith.constant 0 : index
    %c0_18 = arith.constant 0 : index
    %20 = vector.load %arg6[%c0_17, %c0_18] : memref<32x32xbf16, #tpu.memory_space<vmem>>, vector<32x32xbf16>
    %c0_19 = arith.constant 0 : index
    %c0_20 = arith.constant 0 : index
    %21 = vector.load %arg7[%c0_19, %c0_20] : memref<1x32xf32, #tpu.memory_space<vmem>>, vector<1x32xf32>
    %c0_21 = arith.constant 0 : index
    %c0_22 = arith.constant 0 : index
    %22 = vector.load %arg8[%c0_21, %c0_22] : memref<1x32xf32, #tpu.memory_space<vmem>>, vector<1x32xf32>
    %c0_23 = arith.constant 0 : index
    %c0_24 = arith.constant 0 : index
    %23 = vector.load %arg9[%c0_23, %c0_24] : memref<1x32xf32, #tpu.memory_space<vmem>>, vector<1x32xf32>
    %24 = arith.truncf %1 : vector<8x32xf32> to vector<8x32xbf16>
    %cst_25 = arith.constant dense<0.000000e+00> : vector<8x96xf32>
    %25 = tpu.matmul %24, %18, %cst_25 {dimension_numbers = #tpu.dot_dimension_numbers<[1], [0], [0], [1], [0, 0, 1, 1], [], []>} : vector<8x32xbf16>, vector<32x96xbf16>, vector<8x96xf32> -> vector<8x96xf32>
    %26 = vector.broadcast %19 : vector<1x96xf32> to vector<8x96xf32>
    %27 = arith.addf %25, %26 : vector<8x96xf32>
    %28 = arith.truncf %27 : vector<8x96xf32> to vector<8x96xbf16>
    %29 = vector.extract_strided_slice %28 {offsets = [0, 0], sizes = [8, 8], strides = [1, 1]} : vector<8x96xbf16> to vector<8x8xbf16>
    %30 = vector.extract_strided_slice %28 {offsets = [0, 32], sizes = [8, 8], strides = [1, 1]} : vector<8x96xbf16> to vector<8x8xbf16>
    %31 = vector.extract_strided_slice %28 {offsets = [0, 64], sizes = [8, 8], strides = [1, 1]} : vector<8x96xbf16> to vector<8x8xbf16>
    %cst_26 = arith.constant dense<0.000000e+00> : vector<8x8xf32>
    %32 = tpu.matmul %29, %30, %cst_26 {dimension_numbers = #tpu.dot_dimension_numbers<[1], [1], [0], [0], [0, 0, 1, 0], [], []>} : vector<8x8xbf16>, vector<8x8xbf16>, vector<8x8xf32> -> vector<8x8xf32>
    %cst_27 = arith.constant 0.353553385 : f32
    %33 = vector.broadcast %cst_27 : f32 to vector<8x8xf32>
    %34 = arith.mulf %32, %33 : vector<8x8xf32>
    %35 = arith.addf %34, %9 : vector<8x8xf32>
    %cst_28 = arith.constant dense<0xFF800000> : vector<8xf32>
    %36 = vector.multi_reduction <maximumf>, %35, %cst_28 [1] : vector<8x8xf32> to vector<8xf32>
    %37 = vector.shape_cast %36 : vector<8xf32> to vector<8x1xf32>
    %38 = vector.broadcast %37 : vector<8x1xf32> to vector<8x8xf32>
    %39 = arith.subf %35, %38 : vector<8x8xf32>
    %40 = math.exp %39 : vector<8x8xf32>
    %cst_29 = arith.constant dense<0.000000e+00> : vector<8xf32>
    %41 = vector.multi_reduction <add>, %40, %cst_29 [1] : vector<8x8xf32> to vector<8xf32>
    %42 = vector.shape_cast %41 : vector<8xf32> to vector<8x1xf32>
    %43 = tpu.reciprocal %42 {approx = true} : vector<8x1xf32> -> vector<8x1xf32>
    %44 = vector.broadcast %43 : vector<8x1xf32> to vector<8x8xf32>
    %45 = arith.mulf %40, %44 : vector<8x8xf32>
    %46 = arith.truncf %45 : vector<8x8xf32> to vector<8x8xbf16>
    %cst_30 = arith.constant dense<0.000000e+00> : vector<8x8xf32>
    %47 = tpu.matmul %46, %31, %cst_30 {dimension_numbers = #tpu.dot_dimension_numbers<[1], [0], [0], [1], [0, 0, 1, 1], [], []>} : vector<8x8xbf16>, vector<8x8xbf16>, vector<8x8xf32> -> vector<8x8xf32>
    %48 = vector.extract_strided_slice %28 {offsets = [0, 8], sizes = [8, 8], strides = [1, 1]} : vector<8x96xbf16> to vector<8x8xbf16>
    %49 = vector.extract_strided_slice %28 {offsets = [0, 40], sizes = [8, 8], strides = [1, 1]} : vector<8x96xbf16> to vector<8x8xbf16>
    %50 = vector.extract_strided_slice %28 {offsets = [0, 72], sizes = [8, 8], strides = [1, 1]} : vector<8x96xbf16> to vector<8x8xbf16>
    %cst_31 = arith.constant dense<0.000000e+00> : vector<8x8xf32>
    %51 = tpu.matmul %48, %49, %cst_31 {dimension_numbers = #tpu.dot_dimension_numbers<[1], [1], [0], [0], [0, 0, 1, 0], [], []>} : vector<8x8xbf16>, vector<8x8xbf16>, vector<8x8xf32> -> vector<8x8xf32>
    %cst_32 = arith.constant 0.353553385 : f32
    %52 = vector.broadcast %cst_32 : f32 to vector<8x8xf32>
    %53 = arith.mulf %51, %52 : vector<8x8xf32>
    %54 = arith.addf %53, %9 : vector<8x8xf32>
    %cst_33 = arith.constant dense<0xFF800000> : vector<8xf32>
    %55 = vector.multi_reduction <maximumf>, %54, %cst_33 [1] : vector<8x8xf32> to vector<8xf32>
    %56 = vector.shape_cast %55 : vector<8xf32> to vector<8x1xf32>
    %57 = vector.broadcast %56 : vector<8x1xf32> to vector<8x8xf32>
    %58 = arith.subf %54, %57 : vector<8x8xf32>
    %59 = math.exp %58 : vector<8x8xf32>
    %cst_34 = arith.constant dense<0.000000e+00> : vector<8xf32>
    %60 = vector.multi_reduction <add>, %59, %cst_34 [1] : vector<8x8xf32> to vector<8xf32>
    %61 = vector.shape_cast %60 : vector<8xf32> to vector<8x1xf32>
    %62 = tpu.reciprocal %61 {approx = true} : vector<8x1xf32> -> vector<8x1xf32>
    %63 = vector.broadcast %62 : vector<8x1xf32> to vector<8x8xf32>
    %64 = arith.mulf %59, %63 : vector<8x8xf32>
    %65 = arith.truncf %64 : vector<8x8xf32> to vector<8x8xbf16>
    %cst_35 = arith.constant dense<0.000000e+00> : vector<8x8xf32>
    %66 = tpu.matmul %65, %50, %cst_35 {dimension_numbers = #tpu.dot_dimension_numbers<[1], [0], [0], [1], [0, 0, 1, 1], [], []>} : vector<8x8xbf16>, vector<8x8xbf16>, vector<8x8xf32> -> vector<8x8xf32>
    %67 = vector.extract_strided_slice %28 {offsets = [0, 16], sizes = [8, 8], strides = [1, 1]} : vector<8x96xbf16> to vector<8x8xbf16>
    %68 = vector.extract_strided_slice %28 {offsets = [0, 48], sizes = [8, 8], strides = [1, 1]} : vector<8x96xbf16> to vector<8x8xbf16>
    %69 = vector.extract_strided_slice %28 {offsets = [0, 80], sizes = [8, 8], strides = [1, 1]} : vector<8x96xbf16> to vector<8x8xbf16>
    %cst_36 = arith.constant dense<0.000000e+00> : vector<8x8xf32>
    %70 = tpu.matmul %67, %68, %cst_36 {dimension_numbers = #tpu.dot_dimension_numbers<[1], [1], [0], [0], [0, 0, 1, 0], [], []>} : vector<8x8xbf16>, vector<8x8xbf16>, vector<8x8xf32> -> vector<8x8xf32>
    %cst_37 = arith.constant 0.353553385 : f32
    %71 = vector.broadcast %cst_37 : f32 to vector<8x8xf32>
    %72 = arith.mulf %70, %71 : vector<8x8xf32>
    %73 = arith.addf %72, %9 : vector<8x8xf32>
    %cst_38 = arith.constant dense<0xFF800000> : vector<8xf32>
    %74 = vector.multi_reduction <maximumf>, %73, %cst_38 [1] : vector<8x8xf32> to vector<8xf32>
    %75 = vector.shape_cast %74 : vector<8xf32> to vector<8x1xf32>
    %76 = vector.broadcast %75 : vector<8x1xf32> to vector<8x8xf32>
    %77 = arith.subf %73, %76 : vector<8x8xf32>
    %78 = math.exp %77 : vector<8x8xf32>
    %cst_39 = arith.constant dense<0.000000e+00> : vector<8xf32>
    %79 = vector.multi_reduction <add>, %78, %cst_39 [1] : vector<8x8xf32> to vector<8xf32>
    %80 = vector.shape_cast %79 : vector<8xf32> to vector<8x1xf32>
    %81 = tpu.reciprocal %80 {approx = true} : vector<8x1xf32> -> vector<8x1xf32>
    %82 = vector.broadcast %81 : vector<8x1xf32> to vector<8x8xf32>
    %83 = arith.mulf %78, %82 : vector<8x8xf32>
    %84 = arith.truncf %83 : vector<8x8xf32> to vector<8x8xbf16>
    %cst_40 = arith.constant dense<0.000000e+00> : vector<8x8xf32>
    %85 = tpu.matmul %84, %69, %cst_40 {dimension_numbers = #tpu.dot_dimension_numbers<[1], [0], [0], [1], [0, 0, 1, 1], [], []>} : vector<8x8xbf16>, vector<8x8xbf16>, vector<8x8xf32> -> vector<8x8xf32>
    %86 = vector.extract_strided_slice %28 {offsets = [0, 24], sizes = [8, 8], strides = [1, 1]} : vector<8x96xbf16> to vector<8x8xbf16>
    %87 = vector.extract_strided_slice %28 {offsets = [0, 56], sizes = [8, 8], strides = [1, 1]} : vector<8x96xbf16> to vector<8x8xbf16>
    %88 = vector.extract_strided_slice %28 {offsets = [0, 88], sizes = [8, 8], strides = [1, 1]} : vector<8x96xbf16> to vector<8x8xbf16>
    %cst_41 = arith.constant dense<0.000000e+00> : vector<8x8xf32>
    %89 = tpu.matmul %86, %87, %cst_41 {dimension_numbers = #tpu.dot_dimension_numbers<[1], [1], [0], [0], [0, 0, 1, 0], [], []>} : vector<8x8xbf16>, vector<8x8xbf16>, vector<8x8xf32> -> vector<8x8xf32>
    %cst_42 = arith.constant 0.353553385 : f32
    %90 = vector.broadcast %cst_42 : f32 to vector<8x8xf32>
    %91 = arith.mulf %89, %90 : vector<8x8xf32>
    %92 = arith.addf %91, %9 : vector<8x8xf32>
    %cst_43 = arith.constant dense<0xFF800000> : vector<8xf32>
    %93 = vector.multi_reduction <maximumf>, %92, %cst_43 [1] : vector<8x8xf32> to vector<8xf32>
    %94 = vector.shape_cast %93 : vector<8xf32> to vector<8x1xf32>
    %95 = vector.broadcast %94 : vector<8x1xf32> to vector<8x8xf32>
    %96 = arith.subf %92, %95 : vector<8x8xf32>
    %97 = math.exp %96 : vector<8x8xf32>
    %cst_44 = arith.constant dense<0.000000e+00> : vector<8xf32>
    %98 = vector.multi_reduction <add>, %97, %cst_44 [1] : vector<8x8xf32> to vector<8xf32>
    %99 = vector.shape_cast %98 : vector<8xf32> to vector<8x1xf32>
    %100 = tpu.reciprocal %99 {approx = true} : vector<8x1xf32> -> vector<8x1xf32>
    %101 = vector.broadcast %100 : vector<8x1xf32> to vector<8x8xf32>
    %102 = arith.mulf %97, %101 : vector<8x8xf32>
    %103 = arith.truncf %102 : vector<8x8xf32> to vector<8x8xbf16>
    %cst_45 = arith.constant dense<0.000000e+00> : vector<8x8xf32>
    %104 = tpu.matmul %103, %88, %cst_45 {dimension_numbers = #tpu.dot_dimension_numbers<[1], [0], [0], [1], [0, 0, 1, 1], [], []>} : vector<8x8xbf16>, vector<8x8xbf16>, vector<8x8xf32> -> vector<8x8xf32>
    %105 = tpu.concatenate %47, %66, %85, %104 in 1 : vector<8x8xf32>, vector<8x8xf32>, vector<8x8xf32>, vector<8x8xf32> -> vector<8x32xf32>
    %106 = arith.truncf %105 : vector<8x32xf32> to vector<8x32xbf16>
    %cst_46 = arith.constant dense<0.000000e+00> : vector<8x32xf32>
    %107 = tpu.matmul %106, %20, %cst_46 {dimension_numbers = #tpu.dot_dimension_numbers<[1], [0], [0], [1], [0, 0, 1, 1], [], []>} : vector<8x32xbf16>, vector<32x32xbf16>, vector<8x32xf32> -> vector<8x32xf32>
    %108 = vector.broadcast %21 : vector<1x32xf32> to vector<8x32xf32>
    %109 = arith.addf %107, %108 : vector<8x32xf32>
    %110 = arith.addf %109, %1 : vector<8x32xf32>
    %cst_47 = arith.constant dense<0.000000e+00> : vector<8xf32>
    %111 = vector.multi_reduction <add>, %110, %cst_47 [1] : vector<8x32xf32> to vector<8xf32>
    %112 = vector.shape_cast %111 : vector<8xf32> to vector<8x1xf32>
    %cst_48 = arith.constant 3.200000e+01 : f32
    %113 = vector.broadcast %cst_48 : f32 to vector<8x1xf32>
    %114 = arith.divf %112, %113 : vector<8x1xf32>
    %115 = arith.mulf %110, %110 : vector<8x32xf32>
    %cst_49 = arith.constant dense<0.000000e+00> : vector<8xf32>
    %116 = vector.multi_reduction <add>, %115, %cst_49 [1] : vector<8x32xf32> to vector<8xf32>
    %117 = vector.shape_cast %116 : vector<8xf32> to vector<8x1xf32>
    %cst_50 = arith.constant 3.200000e+01 : f32
    %118 = vector.broadcast %cst_50 : f32 to vector<8x1xf32>
    %119 = arith.divf %117, %118 : vector<8x1xf32>
    %120 = arith.mulf %114, %114 : vector<8x1xf32>
    %121 = arith.subf %119, %120 : vector<8x1xf32>
    %cst_51 = arith.constant 0.000000e+00 : f32
    %122 = vector.broadcast %cst_51 : f32 to vector<8x1xf32>
    %123 = arith.maximumf %121, %122 : vector<8x1xf32>
    %124 = vector.broadcast %114 : vector<8x1xf32> to vector<8x32xf32>
    %125 = arith.subf %110, %124 : vector<8x32xf32>
    %cst_52 = arith.constant 9.99999974E-6 : f32
    %126 = vector.broadcast %cst_52 : f32 to vector<8x1xf32>
    %127 = arith.addf %123, %126 : vector<8x1xf32>
    %128 = math.rsqrt %127 : vector<8x1xf32>
    %129 = vector.broadcast %128 : vector<8x1xf32> to vector<8x32xf32>
    %130 = arith.mulf %125, %129 : vector<8x32xf32>
    %131 = vector.broadcast %22 : vector<1x32xf32> to vector<8x32xf32>
    %132 = arith.mulf %130, %131 : vector<8x32xf32>
    %133 = vector.broadcast %23 : vector<1x32xf32> to vector<8x32xf32>
    %134 = arith.addf %132, %133 : vector<8x32xf32>
    %c0_53 = arith.constant 0 : index
    %c0_54 = arith.constant 0 : index
    %135 = vector.load %arg10[%c0_53, %c0_54] : memref<32x96xbf16, #tpu.memory_space<vmem>>, vector<32x96xbf16>
    %c0_55 = arith.constant 0 : index
    %c0_56 = arith.constant 0 : index
    %136 = vector.load %arg11[%c0_55, %c0_56] : memref<1x96xf32, #tpu.memory_space<vmem>>, vector<1x96xf32>
    %c0_57 = arith.constant 0 : index
    %c0_58 = arith.constant 0 : index
    %137 = vector.load %arg12[%c0_57, %c0_58] : memref<32x32xbf16, #tpu.memory_space<vmem>>, vector<32x32xbf16>
    %c0_59 = arith.constant 0 : index
    %c0_60 = arith.constant 0 : index
    %138 = vector.load %arg13[%c0_59, %c0_60] : memref<1x32xf32, #tpu.memory_space<vmem>>, vector<1x32xf32>
    %c0_61 = arith.constant 0 : index
    %c0_62 = arith.constant 0 : index
    %139 = vector.load %arg14[%c0_61, %c0_62] : memref<1x32xf32, #tpu.memory_space<vmem>>, vector<1x32xf32>
    %c0_63 = arith.constant 0 : index
    %c0_64 = arith.constant 0 : index
    %140 = vector.load %arg15[%c0_63, %c0_64] : memref<1x32xf32, #tpu.memory_space<vmem>>, vector<1x32xf32>
    %141 = arith.truncf %134 : vector<8x32xf32> to vector<8x32xbf16>
    %cst_65 = arith.constant dense<0.000000e+00> : vector<8x96xf32>
    %142 = tpu.matmul %141, %135, %cst_65 {dimension_numbers = #tpu.dot_dimension_numbers<[1], [0], [0], [1], [0, 0, 1, 1], [], []>} : vector<8x32xbf16>, vector<32x96xbf16>, vector<8x96xf32> -> vector<8x96xf32>
    %143 = vector.broadcast %136 : vector<1x96xf32> to vector<8x96xf32>
    %144 = arith.addf %142, %143 : vector<8x96xf32>
    %145 = arith.truncf %144 : vector<8x96xf32> to vector<8x96xbf16>
    %146 = vector.extract_strided_slice %145 {offsets = [0, 0], sizes = [8, 8], strides = [1, 1]} : vector<8x96xbf16> to vector<8x8xbf16>
    %147 = vector.extract_strided_slice %145 {offsets = [0, 32], sizes = [8, 8], strides = [1, 1]} : vector<8x96xbf16> to vector<8x8xbf16>
    %148 = vector.extract_strided_slice %145 {offsets = [0, 64], sizes = [8, 8], strides = [1, 1]} : vector<8x96xbf16> to vector<8x8xbf16>
    %cst_66 = arith.constant dense<0.000000e+00> : vector<8x8xf32>
    %149 = tpu.matmul %146, %147, %cst_66 {dimension_numbers = #tpu.dot_dimension_numbers<[1], [1], [0], [0], [0, 0, 1, 0], [], []>} : vector<8x8xbf16>, vector<8x8xbf16>, vector<8x8xf32> -> vector<8x8xf32>
    %cst_67 = arith.constant 0.353553385 : f32
    %150 = vector.broadcast %cst_67 : f32 to vector<8x8xf32>
    %151 = arith.mulf %149, %150 : vector<8x8xf32>
    %152 = arith.addf %151, %17 : vector<8x8xf32>
    %cst_68 = arith.constant dense<0xFF800000> : vector<8xf32>
    %153 = vector.multi_reduction <maximumf>, %152, %cst_68 [1] : vector<8x8xf32> to vector<8xf32>
    %154 = vector.shape_cast %153 : vector<8xf32> to vector<8x1xf32>
    %155 = vector.broadcast %154 : vector<8x1xf32> to vector<8x8xf32>
    %156 = arith.subf %152, %155 : vector<8x8xf32>
    %157 = math.exp %156 : vector<8x8xf32>
    %cst_69 = arith.constant dense<0.000000e+00> : vector<8xf32>
    %158 = vector.multi_reduction <add>, %157, %cst_69 [1] : vector<8x8xf32> to vector<8xf32>
    %159 = vector.shape_cast %158 : vector<8xf32> to vector<8x1xf32>
    %160 = tpu.reciprocal %159 {approx = true} : vector<8x1xf32> -> vector<8x1xf32>
    %161 = vector.broadcast %160 : vector<8x1xf32> to vector<8x8xf32>
    %162 = arith.mulf %157, %161 : vector<8x8xf32>
    %163 = arith.truncf %162 : vector<8x8xf32> to vector<8x8xbf16>
    %cst_70 = arith.constant dense<0.000000e+00> : vector<8x8xf32>
    %164 = tpu.matmul %163, %148, %cst_70 {dimension_numbers = #tpu.dot_dimension_numbers<[1], [0], [0], [1], [0, 0, 1, 1], [], []>} : vector<8x8xbf16>, vector<8x8xbf16>, vector<8x8xf32> -> vector<8x8xf32>
    %165 = vector.extract_strided_slice %145 {offsets = [0, 8], sizes = [8, 8], strides = [1, 1]} : vector<8x96xbf16> to vector<8x8xbf16>
    %166 = vector.extract_strided_slice %145 {offsets = [0, 40], sizes = [8, 8], strides = [1, 1]} : vector<8x96xbf16> to vector<8x8xbf16>
    %167 = vector.extract_strided_slice %145 {offsets = [0, 72], sizes = [8, 8], strides = [1, 1]} : vector<8x96xbf16> to vector<8x8xbf16>
    %cst_71 = arith.constant dense<0.000000e+00> : vector<8x8xf32>
    %168 = tpu.matmul %165, %166, %cst_71 {dimension_numbers = #tpu.dot_dimension_numbers<[1], [1], [0], [0], [0, 0, 1, 0], [], []>} : vector<8x8xbf16>, vector<8x8xbf16>, vector<8x8xf32> -> vector<8x8xf32>
    %cst_72 = arith.constant 0.353553385 : f32
    %169 = vector.broadcast %cst_72 : f32 to vector<8x8xf32>
    %170 = arith.mulf %168, %169 : vector<8x8xf32>
    %171 = arith.addf %170, %17 : vector<8x8xf32>
    %cst_73 = arith.constant dense<0xFF800000> : vector<8xf32>
    %172 = vector.multi_reduction <maximumf>, %171, %cst_73 [1] : vector<8x8xf32> to vector<8xf32>
    %173 = vector.shape_cast %172 : vector<8xf32> to vector<8x1xf32>
    %174 = vector.broadcast %173 : vector<8x1xf32> to vector<8x8xf32>
    %175 = arith.subf %171, %174 : vector<8x8xf32>
    %176 = math.exp %175 : vector<8x8xf32>
    %cst_74 = arith.constant dense<0.000000e+00> : vector<8xf32>
    %177 = vector.multi_reduction <add>, %176, %cst_74 [1] : vector<8x8xf32> to vector<8xf32>
    %178 = vector.shape_cast %177 : vector<8xf32> to vector<8x1xf32>
    %179 = tpu.reciprocal %178 {approx = true} : vector<8x1xf32> -> vector<8x1xf32>
    %180 = vector.broadcast %179 : vector<8x1xf32> to vector<8x8xf32>
    %181 = arith.mulf %176, %180 : vector<8x8xf32>
    %182 = arith.truncf %181 : vector<8x8xf32> to vector<8x8xbf16>
    %cst_75 = arith.constant dense<0.000000e+00> : vector<8x8xf32>
    %183 = tpu.matmul %182, %167, %cst_75 {dimension_numbers = #tpu.dot_dimension_numbers<[1], [0], [0], [1], [0, 0, 1, 1], [], []>} : vector<8x8xbf16>, vector<8x8xbf16>, vector<8x8xf32> -> vector<8x8xf32>
    %184 = vector.extract_strided_slice %145 {offsets = [0, 16], sizes = [8, 8], strides = [1, 1]} : vector<8x96xbf16> to vector<8x8xbf16>
    %185 = vector.extract_strided_slice %145 {offsets = [0, 48], sizes = [8, 8], strides = [1, 1]} : vector<8x96xbf16> to vector<8x8xbf16>
    %186 = vector.extract_strided_slice %145 {offsets = [0, 80], sizes = [8, 8], strides = [1, 1]} : vector<8x96xbf16> to vector<8x8xbf16>
    %cst_76 = arith.constant dense<0.000000e+00> : vector<8x8xf32>
    %187 = tpu.matmul %184, %185, %cst_76 {dimension_numbers = #tpu.dot_dimension_numbers<[1], [1], [0], [0], [0, 0, 1, 0], [], []>} : vector<8x8xbf16>, vector<8x8xbf16>, vector<8x8xf32> -> vector<8x8xf32>
    %cst_77 = arith.constant 0.353553385 : f32
    %188 = vector.broadcast %cst_77 : f32 to vector<8x8xf32>
    %189 = arith.mulf %187, %188 : vector<8x8xf32>
    %190 = arith.addf %189, %17 : vector<8x8xf32>
    %cst_78 = arith.constant dense<0xFF800000> : vector<8xf32>
    %191 = vector.multi_reduction <maximumf>, %190, %cst_78 [1] : vector<8x8xf32> to vector<8xf32>
    %192 = vector.shape_cast %191 : vector<8xf32> to vector<8x1xf32>
    %193 = vector.broadcast %192 : vector<8x1xf32> to vector<8x8xf32>
    %194 = arith.subf %190, %193 : vector<8x8xf32>
    %195 = math.exp %194 : vector<8x8xf32>
    %cst_79 = arith.constant dense<0.000000e+00> : vector<8xf32>
    %196 = vector.multi_reduction <add>, %195, %cst_79 [1] : vector<8x8xf32> to vector<8xf32>
    %197 = vector.shape_cast %196 : vector<8xf32> to vector<8x1xf32>
    %198 = tpu.reciprocal %197 {approx = true} : vector<8x1xf32> -> vector<8x1xf32>
    %199 = vector.broadcast %198 : vector<8x1xf32> to vector<8x8xf32>
    %200 = arith.mulf %195, %199 : vector<8x8xf32>
    %201 = arith.truncf %200 : vector<8x8xf32> to vector<8x8xbf16>
    %cst_80 = arith.constant dense<0.000000e+00> : vector<8x8xf32>
    %202 = tpu.matmul %201, %186, %cst_80 {dimension_numbers = #tpu.dot_dimension_numbers<[1], [0], [0], [1], [0, 0, 1, 1], [], []>} : vector<8x8xbf16>, vector<8x8xbf16>, vector<8x8xf32> -> vector<8x8xf32>
    %203 = vector.extract_strided_slice %145 {offsets = [0, 24], sizes = [8, 8], strides = [1, 1]} : vector<8x96xbf16> to vector<8x8xbf16>
    %204 = vector.extract_strided_slice %145 {offsets = [0, 56], sizes = [8, 8], strides = [1, 1]} : vector<8x96xbf16> to vector<8x8xbf16>
    %205 = vector.extract_strided_slice %145 {offsets = [0, 88], sizes = [8, 8], strides = [1, 1]} : vector<8x96xbf16> to vector<8x8xbf16>
    %cst_81 = arith.constant dense<0.000000e+00> : vector<8x8xf32>
    %206 = tpu.matmul %203, %204, %cst_81 {dimension_numbers = #tpu.dot_dimension_numbers<[1], [1], [0], [0], [0, 0, 1, 0], [], []>} : vector<8x8xbf16>, vector<8x8xbf16>, vector<8x8xf32> -> vector<8x8xf32>
    %cst_82 = arith.constant 0.353553385 : f32
    %207 = vector.broadcast %cst_82 : f32 to vector<8x8xf32>
    %208 = arith.mulf %206, %207 : vector<8x8xf32>
    %209 = arith.addf %208, %17 : vector<8x8xf32>
    %cst_83 = arith.constant dense<0xFF800000> : vector<8xf32>
    %210 = vector.multi_reduction <maximumf>, %209, %cst_83 [1] : vector<8x8xf32> to vector<8xf32>
    %211 = vector.shape_cast %210 : vector<8xf32> to vector<8x1xf32>
    %212 = vector.broadcast %211 : vector<8x1xf32> to vector<8x8xf32>
    %213 = arith.subf %209, %212 : vector<8x8xf32>
    %214 = math.exp %213 : vector<8x8xf32>
    %cst_84 = arith.constant dense<0.000000e+00> : vector<8xf32>
    %215 = vector.multi_reduction <add>, %214, %cst_84 [1] : vector<8x8xf32> to vector<8xf32>
    %216 = vector.shape_cast %215 : vector<8xf32> to vector<8x1xf32>
    %217 = tpu.reciprocal %216 {approx = true} : vector<8x1xf32> -> vector<8x1xf32>
    %218 = vector.broadcast %217 : vector<8x1xf32> to vector<8x8xf32>
    %219 = arith.mulf %214, %218 : vector<8x8xf32>
    %220 = arith.truncf %219 : vector<8x8xf32> to vector<8x8xbf16>
    %cst_85 = arith.constant dense<0.000000e+00> : vector<8x8xf32>
    %221 = tpu.matmul %220, %205, %cst_85 {dimension_numbers = #tpu.dot_dimension_numbers<[1], [0], [0], [1], [0, 0, 1, 1], [], []>} : vector<8x8xbf16>, vector<8x8xbf16>, vector<8x8xf32> -> vector<8x8xf32>
    %222 = tpu.concatenate %164, %183, %202, %221 in 1 : vector<8x8xf32>, vector<8x8xf32>, vector<8x8xf32>, vector<8x8xf32> -> vector<8x32xf32>
    %223 = arith.truncf %222 : vector<8x32xf32> to vector<8x32xbf16>
    %cst_86 = arith.constant dense<0.000000e+00> : vector<8x32xf32>
    %224 = tpu.matmul %223, %137, %cst_86 {dimension_numbers = #tpu.dot_dimension_numbers<[1], [0], [0], [1], [0, 0, 1, 1], [], []>} : vector<8x32xbf16>, vector<32x32xbf16>, vector<8x32xf32> -> vector<8x32xf32>
    %225 = vector.broadcast %138 : vector<1x32xf32> to vector<8x32xf32>
    %226 = arith.addf %224, %225 : vector<8x32xf32>
    %227 = arith.addf %226, %134 : vector<8x32xf32>
    %cst_87 = arith.constant dense<0.000000e+00> : vector<8xf32>
    %228 = vector.multi_reduction <add>, %227, %cst_87 [1] : vector<8x32xf32> to vector<8xf32>
    %229 = vector.shape_cast %228 : vector<8xf32> to vector<8x1xf32>
    %cst_88 = arith.constant 3.200000e+01 : f32
    %230 = vector.broadcast %cst_88 : f32 to vector<8x1xf32>
    %231 = arith.divf %229, %230 : vector<8x1xf32>
    %232 = arith.mulf %227, %227 : vector<8x32xf32>
    %cst_89 = arith.constant dense<0.000000e+00> : vector<8xf32>
    %233 = vector.multi_reduction <add>, %232, %cst_89 [1] : vector<8x32xf32> to vector<8xf32>
    %234 = vector.shape_cast %233 : vector<8xf32> to vector<8x1xf32>
    %cst_90 = arith.constant 3.200000e+01 : f32
    %235 = vector.broadcast %cst_90 : f32 to vector<8x1xf32>
    %236 = arith.divf %234, %235 : vector<8x1xf32>
    %237 = arith.mulf %231, %231 : vector<8x1xf32>
    %238 = arith.subf %236, %237 : vector<8x1xf32>
    %cst_91 = arith.constant 0.000000e+00 : f32
    %239 = vector.broadcast %cst_91 : f32 to vector<8x1xf32>
    %240 = arith.maximumf %238, %239 : vector<8x1xf32>
    %241 = vector.broadcast %231 : vector<8x1xf32> to vector<8x32xf32>
    %242 = arith.subf %227, %241 : vector<8x32xf32>
    %cst_92 = arith.constant 9.99999974E-6 : f32
    %243 = vector.broadcast %cst_92 : f32 to vector<8x1xf32>
    %244 = arith.addf %240, %243 : vector<8x1xf32>
    %245 = math.rsqrt %244 : vector<8x1xf32>
    %246 = vector.broadcast %245 : vector<8x1xf32> to vector<8x32xf32>
    %247 = arith.mulf %242, %246 : vector<8x32xf32>
    %248 = vector.broadcast %139 : vector<1x32xf32> to vector<8x32xf32>
    %249 = arith.mulf %247, %248 : vector<8x32xf32>
    %250 = vector.broadcast %140 : vector<1x32xf32> to vector<8x32xf32>
    %251 = arith.addf %249, %250 : vector<8x32xf32>
    %c0_93 = arith.constant 0 : index
    %c0_94 = arith.constant 0 : index
    %252 = vector.load %arg16[%c0_93, %c0_94] : memref<32x64xbf16, #tpu.memory_space<vmem>>, vector<32x64xbf16>
    %c0_95 = arith.constant 0 : index
    %c0_96 = arith.constant 0 : index
    %253 = vector.load %arg17[%c0_95, %c0_96] : memref<1x64xf32, #tpu.memory_space<vmem>>, vector<1x64xf32>
    %c0_97 = arith.constant 0 : index
    %c0_98 = arith.constant 0 : index
    %254 = vector.load %arg18[%c0_97, %c0_98] : memref<64x32xbf16, #tpu.memory_space<vmem>>, vector<64x32xbf16>
    %c0_99 = arith.constant 0 : index
    %c0_100 = arith.constant 0 : index
    %255 = vector.load %arg19[%c0_99, %c0_100] : memref<1x32xf32, #tpu.memory_space<vmem>>, vector<1x32xf32>
    %c0_101 = arith.constant 0 : index
    %c0_102 = arith.constant 0 : index
    %256 = vector.load %arg20[%c0_101, %c0_102] : memref<1x32xf32, #tpu.memory_space<vmem>>, vector<1x32xf32>
    %c0_103 = arith.constant 0 : index
    %c0_104 = arith.constant 0 : index
    %257 = vector.load %arg21[%c0_103, %c0_104] : memref<1x32xf32, #tpu.memory_space<vmem>>, vector<1x32xf32>
    %258 = arith.truncf %251 : vector<8x32xf32> to vector<8x32xbf16>
    %cst_105 = arith.constant dense<0.000000e+00> : vector<8x64xf32>
    %259 = tpu.matmul %258, %252, %cst_105 {dimension_numbers = #tpu.dot_dimension_numbers<[1], [0], [0], [1], [0, 0, 1, 1], [], []>} : vector<8x32xbf16>, vector<32x64xbf16>, vector<8x64xf32> -> vector<8x64xf32>
    %260 = vector.broadcast %253 : vector<1x64xf32> to vector<8x64xf32>
    %261 = arith.addf %259, %260 : vector<8x64xf32>
    %cst_106 = arith.constant 0.000000e+00 : f32
    %262 = vector.broadcast %cst_106 : f32 to vector<8x64xf32>
    %263 = arith.maximumf %261, %262 : vector<8x64xf32>
    %264 = arith.truncf %263 : vector<8x64xf32> to vector<8x64xbf16>
    %cst_107 = arith.constant dense<0.000000e+00> : vector<8x32xf32>
    %265 = tpu.matmul %264, %254, %cst_107 {dimension_numbers = #tpu.dot_dimension_numbers<[1], [0], [0], [1], [0, 0, 1, 1], [], []>} : vector<8x64xbf16>, vector<64x32xbf16>, vector<8x32xf32> -> vector<8x32xf32>
    %266 = vector.broadcast %255 : vector<1x32xf32> to vector<8x32xf32>
    %267 = arith.addf %265, %266 : vector<8x32xf32>
    %268 = arith.addf %267, %251 : vector<8x32xf32>
    %cst_108 = arith.constant dense<0.000000e+00> : vector<8xf32>
    %269 = vector.multi_reduction <add>, %268, %cst_108 [1] : vector<8x32xf32> to vector<8xf32>
    %270 = vector.shape_cast %269 : vector<8xf32> to vector<8x1xf32>
    %cst_109 = arith.constant 3.200000e+01 : f32
    %271 = vector.broadcast %cst_109 : f32 to vector<8x1xf32>
    %272 = arith.divf %270, %271 : vector<8x1xf32>
    %273 = arith.mulf %268, %268 : vector<8x32xf32>
    %cst_110 = arith.constant dense<0.000000e+00> : vector<8xf32>
    %274 = vector.multi_reduction <add>, %273, %cst_110 [1] : vector<8x32xf32> to vector<8xf32>
    %275 = vector.shape_cast %274 : vector<8xf32> to vector<8x1xf32>
    %cst_111 = arith.constant 3.200000e+01 : f32
    %276 = vector.broadcast %cst_111 : f32 to vector<8x1xf32>
    %277 = arith.divf %275, %276 : vector<8x1xf32>
    %278 = arith.mulf %272, %272 : vector<8x1xf32>
    %279 = arith.subf %277, %278 : vector<8x1xf32>
    %cst_112 = arith.constant 0.000000e+00 : f32
    %280 = vector.broadcast %cst_112 : f32 to vector<8x1xf32>
    %281 = arith.maximumf %279, %280 : vector<8x1xf32>
    %282 = vector.broadcast %272 : vector<8x1xf32> to vector<8x32xf32>
    %283 = arith.subf %268, %282 : vector<8x32xf32>
    %cst_113 = arith.constant 9.99999974E-6 : f32
    %284 = vector.broadcast %cst_113 : f32 to vector<8x1xf32>
    %285 = arith.addf %281, %284 : vector<8x1xf32>
    %286 = math.rsqrt %285 : vector<8x1xf32>
    %287 = vector.broadcast %286 : vector<8x1xf32> to vector<8x32xf32>
    %288 = arith.mulf %283, %287 : vector<8x32xf32>
    %289 = vector.broadcast %256 : vector<1x32xf32> to vector<8x32xf32>
    %290 = arith.mulf %288, %289 : vector<8x32xf32>
    %291 = vector.broadcast %257 : vector<1x32xf32> to vector<8x32xf32>
    %292 = arith.addf %290, %291 : vector<8x32xf32>
    %c0_114 = arith.constant 0 : index
    %c0_115 = arith.constant 0 : index
    %c0_116 = arith.constant 0 : index
    %293 = vector.load %arg22[%c0_114, %c0_115, %c0_116] : memref<1x8x32xf32, #tpu.memory_space<vmem>>, vector<1x8x32xf32>
    %294 = vector.shape_cast %293 : vector<1x8x32xf32> to vector<8x32xf32>
    %295 = vector.shape_cast %292 : vector<8x32xf32> to vector<1x8x32xf32>
    tpu.vector_store %arg22[%c0_114, %c0_115, %c0_116], %295 {strides = array<i32>} : memref<1x8x32xf32, #tpu.memory_space<vmem>>, vector<1x8x32xf32>,
    return
  }
  func.func @transform_0(%arg0: i32) -> (i32, i32, i32) {
    %c0_i32 = arith.constant 0 : i32
    %c0_i32_0 = arith.constant 0 : i32
    %c0_i32_1 = arith.constant 0 : i32
    return %arg0, %c0_i32, %c0_i32_0 : i32, i32, i32
  }
  func.func @transform_1(%arg0: i32) -> (i32, i32, i32) {
    %c0_i32 = arith.constant 0 : i32
    %c0_i32_0 = arith.constant 0 : i32
    %c0_i32_1 = arith.constant 0 : i32
    return %arg0, %c0_i32, %c0_i32_0 : i32, i32, i32
  }
  func.func @transform_2(%arg0: i32) -> (i32, i32, i32) {
    %c0_i32 = arith.constant 0 : i32
    %c0_i32_0 = arith.constant 0 : i32
    %c0_i32_1 = arith.constant 0 : i32
    return %arg0, %c0_i32, %c0_i32_0 : i32, i32, i32
  }
  func.func @transform_3(%arg0: i32) -> (i32, i32) {
    %c0_i32 = arith.constant 0 : i32
    %c0_i32_0 = arith.constant 0 : i32
    %c0_i32_1 = arith.constant 0 : i32
    return %c0_i32, %c0_i32_0 : i32, i32
  }
  func.func @transform_4(%arg0: i32) -> (i32, i32) {
    %c0_i32 = arith.constant 0 : i32
    %c0_i32_0 = arith.constant 0 : i32
    %c0_i32_1 = arith.constant 0 : i32
    return %c0_i32, %c0_i32_0 : i32, i32
  }
  func.func @transform_5(%arg0: i32) -> (i32, i32) {
    %c0_i32 = arith.constant 0 : i32
    %c0_i32_0 = arith.constant 0 : i32
    %c0_i32_1 = arith.constant 0 : i32
    return %c0_i32, %c0_i32_0 : i32, i32
  }
  func.func @transform_6(%arg0: i32) -> (i32, i32) {
    %c0_i32 = arith.constant 0 : i32
    %c0_i32_0 = arith.constant 0 : i32
    %c0_i32_1 = arith.constant 0 : i32
    return %c0_i32, %c0_i32_0 : i32, i32
  }
  func.func @transform_7(%arg0: i32) -> (i32, i32) {
    %c0_i32 = arith.constant 0 : i32
    %c0_i32_0 = arith.constant 0 : i32
    %c0_i32_1 = arith.constant 0 : i32
    return %c0_i32, %c0_i32_0 : i32, i32
  }
  func.func @transform_8(%arg0: i32) -> (i32, i32) {
    %c0_i32 = arith.constant 0 : i32
    %c0_i32_0 = arith.constant 0 : i32
    %c0_i32_1 = arith.constant 0 : i32
    return %c0_i32, %c0_i32_0 : i32, i32
  }
  func.func @transform_9(%arg0: i32) -> (i32, i32) {
    %c0_i32 = arith.constant 0 : i32
    %c0_i32_0 = arith.constant 0 : i32
    %c0_i32_1 = arith.constant 0 : i32
    return %c0_i32, %c0_i32_0 : i32, i32
  }
  func.func @transform_10(%arg0: i32) -> (i32, i32) {
    %c0_i32 = arith.constant 0 : i32
    %c0_i32_0 = arith.constant 0 : i32
    %c0_i32_1 = arith.constant 0 : i32
    return %c0_i32, %c0_i32_0 : i32, i32
  }
  func.func @transform_11(%arg0: i32) -> (i32, i32) {
    %c0_i32 = arith.constant 0 : i32
    %c0_i32_0 = arith.constant 0 : i32
    %c0_i32_1 = arith.constant 0 : i32
    return %c0_i32, %c0_i32_0 : i32, i32
  }
  func.func @transform_12(%arg0: i32) -> (i32, i32) {
    %c0_i32 = arith.constant 0 : i32
    %c0_i32_0 = arith.constant 0 : i32
    %c0_i32_1 = arith.constant 0 : i32
    return %c0_i32, %c0_i32_0 : i32, i32
  }
  func.func @transform_13(%arg0: i32) -> (i32, i32) {
    %c0_i32 = arith.constant 0 : i32
    %c0_i32_0 = arith.constant 0 : i32
    %c0_i32_1 = arith.constant 0 : i32
    return %c0_i32, %c0_i32_0 : i32, i32
  }
  func.func @transform_14(%arg0: i32) -> (i32, i32) {
    %c0_i32 = arith.constant 0 : i32
    %c0_i32_0 = arith.constant 0 : i32
    %c0_i32_1 = arith.constant 0 : i32
    return %c0_i32, %c0_i32_0 : i32, i32
  }
  func.func @transform_15(%arg0: i32) -> (i32, i32) {
    %c0_i32 = arith.constant 0 : i32
    %c0_i32_0 = arith.constant 0 : i32
    %c0_i32_1 = arith.constant 0 : i32
    return %c0_i32, %c0_i32_0 : i32, i32
  }
  func.func @transform_16(%arg0: i32) -> (i32, i32) {
    %c0_i32 = arith.constant 0 : i32
    %c0_i32_0 = arith.constant 0 : i32
    %c0_i32_1 = arith.constant 0 : i32
    return %c0_i32, %c0_i32_0 : i32, i32
  }
  func.func @transform_17(%arg0: i32) -> (i32, i32) {
    %c0_i32 = arith.constant 0 : i32
    %c0_i32_0 = arith.constant 0 : i32
    %c0_i32_1 = arith.constant 0 : i32
    return %c0_i32, %c0_i32_0 : i32, i32
  }
  func.func @transform_18(%arg0: i32) -> (i32, i32) {
    %c0_i32 = arith.constant 0 : i32
    %c0_i32_0 = arith.constant 0 : i32
    %c0_i32_1 = arith.constant 0 : i32
    return %c0_i32, %c0_i32_0 : i32, i32
  }
  func.func @transform_19(%arg0: i32) -> (i32, i32) {
    %c0_i32 = arith.constant 0 : i32
    %c0_i32_0 = arith.constant 0 : i32
    %c0_i32_1 = arith.constant 0 : i32
    return %c0_i32, %c0_i32_0 : i32, i32
  }
  func.func @transform_20(%arg0: i32) -> (i32, i32) {
    %c0_i32 = arith.constant 0 : i32
    %c0_i32_0 = arith.constant 0 : i32
    %c0_i32_1 = arith.constant 0 : i32
    return %c0_i32, %c0_i32_0 : i32, i32
  }
  func.func @transform_21(%arg0: i32) -> (i32, i32, i32) {
    %c0_i32 = arith.constant 0 : i32
    %c0_i32_0 = arith.constant 0 : i32
    %c0_i32_1 = arith.constant 0 : i32
    return %arg0, %c0_i32, %c0_i32_0 : i32, i32, i32
  }
}

</mosaic_0001>

<bundles_post_ra>
// kernel: transformer_encoder.2
= control target key start
LH: loop header
LB: loop body
LE: loop exit
PB: predicated region body
PF: predicated region fallthrough
CT: control target
= control target key end

     0   :  { %s5081_s0 = inlined_call_operand.hbm [shape: f32[2,8,32], index: 0, kind: input, shape index: {}, may-alias: {0,21}]   ;;  %s5082_s1 = inlined_call_operand.hbm [shape: s8[2,8,8], index: 1, kind: input, shape index: {}]   ;;  %s5083_s2 = inlined_call_operand.hbm [shape: s8[2,8,8], index: 2, kind: input, shape index: {}]   ;;  %s5084_s3 = inlined_call_operand.hbm [shape: bf16[32,96], index: 3, kind: input, shape index: {}]   ;;  %s5085_s4 = inlined_call_operand.hbm [shape: f32[1,96], index: 4, kind: input, shape index: {}]   ;;  %s5086_s5 = inlined_call_operand.hbm [shape: bf16[32,32], index: 5, kind: input, shape index: {}]   ;;  %s5087_s6 = inlined_call_operand.hbm [shape: f32[1,32], index: 6, kind: input, shape index: {}]   ;;  %s5088_s7 = inlined_call_operand.hbm [shape: f32[1,32], index: 7, kind: input, shape index: {}]   ;;  %s5089_s8 = inlined_call_operand.hbm [shape: f32[1,32], index: 8, kind: input, shape index: {}]   ;;  %s5090_s9 = inlined_call_operand.hbm [shape: bf16[32,96], index: 9, kind: input, shape index: {}]   ;;  %s5091_s10 = inlined_call_operand.hbm [shape: f32[1,96], index: 10, kind: input, shape index: {}]   ;;  %s5092_s11 = inlined_call_operand.hbm [shape: bf16[32,32], index: 11, kind: input, shape index: {}]   ;;  %s5093_s12 = inlined_call_operand.hbm [shape: f32[1,32], index: 12, kind: input, shape index: {}]   ;;  %s5094_s13 = inlined_call_operand.hbm [shape: f32[1,32], index: 13, kind: input, shape index: {}]   ;;  %s5095_s14 = inlined_call_operand.hbm [shape: f32[1,32], index: 14, kind: input, shape index: {}]   ;;  %s5096_s15 = inlined_call_operand.hbm [shape: bf16[32,64], index: 15, kind: input, shape index: {}]   ;;  %s5097_s16 = inlined_call_operand.hbm [shape: f32[1,64], index: 16, kind: input, shape index: {}]   ;;  %s5098_s17 = inlined_call_operand.hbm [shape: bf16[64,32], index: 17, kind: input, shape index: {}]   ;;  %s5099_s18 = inlined_call_operand.hbm [shape: f32[1,32], index: 18, kind: input, shape index: {}]   ;;  %s5100_s19 = inlined_call_operand.hbm [shape: f32[1,32], index: 19, kind: input, shape index: {}]   ;;  %s5101_s20 = inlined_call_operand.hbm [shape: f32[1,32], index: 20, kind: input, shape index: {}]   ;;  %s5102_s21 = inlined_call_operand.hbm [shape: f32[2,8,32], index: 21, kind: output, shape index: {}, may-alias: {0,21}]  }
   0x1   :  { %5144 = sst [smem:[#allocation52_spill]] %s5081_s0 }
   0x2   :  { %5145 = sst [smem:[#allocation53_spill]] %s5082_s1 }
   0x3   :  { %5146 = sst [smem:[#allocation54_spill]] %s5083_s2 }
   0x4   :  { %5147 = sst [smem:[#allocation55_spill]] %s5084_s3 }
   0x5   :  { %5148 = sst [smem:[#allocation56_spill]] %s5085_s4 }
   0x6   :  { %5149 = sst [smem:[#allocation57_spill]] %s5086_s5 }
   0x7   :  { %5150 = sst [smem:[#allocation58_spill]] %s5087_s6 }
   0x8   :  { %5151 = sst [smem:[#allocation59_spill]] %s5088_s7 }
   0x9   :  { %5152 = sst [smem:[#allocation60_spill]] %s5089_s8 }
   0xa   :  { %5153 = sst [smem:[#allocation61_spill]] %s5090_s9 }
   0xb   :  { %5154 = sst [smem:[#allocation62_spill]] %s5091_s10 }
   0xc   :  { %5155 = sst [smem:[#allocation63_spill]] %s5092_s11 }
   0xd   :  { %5156 = sst [smem:[#allocation64_spill]] %s5093_s12 }
   0xe   :  { %5157 = sst [smem:[#allocation65_spill]] %s5094_s13 }
   0xf   :  { %5158 = sst [smem:[#allocation66_spill]] %s5095_s14 }
  0x10   :  { %5159 = sst [smem:[#allocation67_spill]] %s5096_s15 }
  0x11   :  { %5160 = sst [smem:[#allocation68_spill]] %s5097_s16 }
  0x12   :  { %5161 = sst [smem:[#allocation69_spill]] %s5098_s17 }
  0x13   :  { %5162 = sst [smem:[#allocation70_spill]] %s5099_s18 }
  0x14   :  { %5163 = sst [smem:[#allocation71_spill]] %s5100_s19 }
  0x15   :  { %5164 = sst [smem:[#allocation72_spill]] %s5101_s20 }
  0x16   :  { %5165 = sst [smem:[#allocation73_spill]] %s5102_s21 }
  0x17   :  { %26 = vsyncpa [#allocation3], 0 }
  0x18   :  { %28 = vsyncpa [#allocation3 + $0x1], 0 }
  0x19   :  { %29 = vsyncpa [#allocation6], 0 }
  0x1a   :  { %31 = vsyncpa [#allocation6 + $0x1], 0 }
  0x1b   :  { %32 = vsyncpa [#allocation9], 0 }
  0x1c   :  { %33 = vsyncpa [#allocation12], 0 }
  0x1d   :  { %34 = vsyncpa [#allocation15], 0 }
  0x1e   :  { %35 = vsyncpa [#allocation18], 0 }
  0x1f   :  { %36 = vsyncpa [#allocation21], 0 }
  0x20   :  { %37 = vsyncpa [#allocation24], 0 }
  0x21   :  { %38 = vsyncpa [#allocation27], 0 }
  0x22   :  { %39 = vsyncpa [#allocation30], 0 }
  0x23   :  { %40 = vsyncpa [#allocation33], 0 }
  0x24   :  { %41 = vsyncpa [#allocation4], 0 }
  0x25   :  { %43 = vsyncpa [#allocation4 + $0x1], 0  ;;  %s4205_s2 = smov 0   ;;  %s4207_s25 = smov 0  }
  0x26   :  { %s4209_s26 = smov 0   ;;  %s4211_s27 = smov 0  }
  0x27 LB: > { %5166 = sst [smem:[#allocation48_spill]] %s4048_s26  ;;  %s4054_s3 = smov [#allocation8]   ;;  %s4052_s27 = sphi %s4211_s27, %s5233_s27   ;;  %s4048_s26 = sphi %s4209_s26, %s5235_s26   ;;  %s4044_s25 = sphi %s4207_s25, %s5237_s25   ;;  %s4040_s2 = sphi %s4205_s2, %s5236_s2  }
  0x28   : > { %s548_s28 = sshll.u32 %s4054_s3, 4  ;;  %s4226_s29 = sadd.s32 4294967295, %s4052_s27   ;;  %s4231_s28 = int_to_ptr.vmem [resolvable:$true] %s548_s28 }
  0x29   : > { %p2743_p0 = scmp.ge.s32.totalorder %s4052_s27, 1  ;;  %p5120_p1 = scmp.eq.s32.totalorder %s4226_s29, 0 }
  0x2a   : > { %p536_p2 = scmp.lt.s32.totalorder %s4052_s27, 3  ;;  %s4055_s4 = smov [#allocation11]  }
  0x2b   : > { %s572_s30 = sshll.u32 %s4055_s4, 4  ;;  %s4056_s22 = smov [#allocation14]   ;;  %s4246_s30 = int_to_ptr.vmem [resolvable:$true] %s572_s30 }
  0x2c   : > { %p4233_p3 = pnand %p2743_p0, %p536_p2  ;;  %s597_s23 = sshll.u32 %s4056_s22, 4  ;;  %s4248_s23 = int_to_ptr.vmem [resolvable:$true] %s597_s23 }
  0x2d   : > { %s5170_s3 = sld [smem:[#allocation55_spill]] }
  0x2e   : > { %s5167_s0 = scalar_select %p4233_p3, 1, 0 }
  0x2f   : > { %p3124_p5 = pneg %p4233_p3 }
  0x30   : > { %5168 = sst [smem:[#allocation49_spill]] %s5167_s0 }
  0x31   : > { %p4242_p6 = pnand %p3124_p5, %p5120_p1 }
  0x33   : > { %s5169_s5 = scalar_select %p4242_p6, 1, 0 }
  0x34   : > { %s3352_s21 = scalar_lea.hbm %s5170_s3, 256  ;;  %p4258_p8 = pneg %p4242_p6 }
  0x35   : > { %p3353_p7 = scmp.ne.s32.totalorder %s5170_s3, %s3352_s21  ;;  %p3359_p11 = scmp.lt.u32.totalorder %s3352_s21, %s5170_s3 }
  0x36   : > { %s5171_s4 = scalar_select %p4258_p8, 1, 0 }
  0x37   : > { %p3355_p9 = pnand %p4258_p8, %p3353_p7 }
  0x39   : > { %p3356_p10 = pneg %p3355_p9 }
  0x3b   : > { %p3361_p12 = pnand %p3359_p11, %p3356_p10 }
  0x3d   : > { %3364 = shalt.err (!%p3361_p12)
}
  0x3e   : > { %s3365_s20 = scalar_lea.vmem %s4231_s28, 256  ;;  %p3373_p5 = scmp.lt.s32.totalorder %s4231_s28, %s4231_s28 }
  0x3f   : > { %p3366_p13 = scmp.ne.s32.totalorder %s4231_s28, %s3365_s20  ;;  %p3374_p4 = scmp.lt.s32.totalorder %s3365_s20, %s3365_s20 }
  0x41   : > { %p3368_p0 = pnand %p3366_p13, %p4258_p8  ;;  %p3375_p7 = por %p3374_p4, %p3373_p5 }
  0x43   : > { %p3369_p2 = pneg %p3368_p0 }
  0x45   : > { %p3376_p9 = pnand %p3375_p7, %p3369_p2 }
  0x47   : > { %3379 = shalt.err (!%p3376_p9)
}
  0x48   : > { %s5118_s0 = smov 64   ;;  %s4058_s18 = smov 4  }
  0x49   : > { %3127 = dma.hbm_to_vmem [thread:$0]  (!%p4242_p6), %s5170_s3, 256, %s4231_s28, [#allocation9], %s5118_s0, %s5118_s0, %s4058_s18  }
  0x4a   : > { %s5172_s16 = sld [smem:[#allocation57_spill]] }
  0x50   : > { %s3380_s20 = scalar_lea.hbm %s5172_s16, 256 }
  0x51   : > { %p3381_p4 = scmp.ne.s32.totalorder %s5172_s16, %s3380_s20  ;;  %p3387_p12 = scmp.lt.u32.totalorder %s3380_s20, %s5172_s16 }
  0x53   : > { %p3383_p10 = pnand %p3381_p4, %p4258_p8 }
  0x55   : > { %p3384_p11 = pneg %p3383_p10 }
  0x57   : > { %p3389_p13 = pnand %p3387_p12, %p3384_p11 }
  0x59   : > { %3392 = shalt.err (!%p3389_p13)
}
  0x5a   : > { %s3393_s28 = scalar_lea.vmem %s4246_s30, 256  ;;  %p3401_p7 = scmp.lt.s32.totalorder %s4246_s30, %s4246_s30 }
  0x5b   : > { %p3394_p0 = scmp.ne.s32.totalorder %s4246_s30, %s3393_s28  ;;  %p3402_p9 = scmp.lt.s32.totalorder %s3393_s28, %s3393_s28 }
  0x5d   : > { %p3396_p2 = pnand %p3394_p0, %p4258_p8  ;;  %p3403_p4 = por %p3402_p9, %p3401_p7 }
  0x5f   : > { %p3397_p5 = pneg %p3396_p2 }
  0x61   : > { %p3404_p10 = pnand %p3403_p4, %p3397_p5 }
  0x63   : > { %3407 = shalt.err (!%p3404_p10)
}
  0x64   : > { %3133 = dma.hbm_to_vmem [thread:$0]  (!%p4242_p6), %s5172_s16, 256, %s4246_s30, [#allocation12], %s5118_s0, %s5118_s0, %s4058_s18  }
  0x65   : > { %s5173_s7 = sld [smem:[#allocation59_spill]] }
  0x6b   : > { %s3408_s21 = scalar_lea.hbm %s5173_s7, 16 }
  0x6c   : > { %p3409_p11 = scmp.ne.s32.totalorder %s5173_s7, %s3408_s21  ;;  %p3415_p0 = scmp.lt.u32.totalorder %s3408_s21, %s5173_s7 }
  0x6e   : > { %p3411_p12 = pnand %p3409_p11, %p4258_p8 }
  0x70   : > { %p3412_p13 = pneg %p3411_p12 }
  0x72   : > { %p3417_p2 = pnand %p3415_p0, %p3412_p13 }
  0x74   : > { %3420 = shalt.err (!%p3417_p2)
}
  0x75   : > { %s3421_s30 = scalar_lea.vmem %s4248_s23, 16  ;;  %s3428_s28 = scalar_lea.vmem %s4248_s23, 32 }
  0x76   : > { %p3422_p5 = scmp.ne.s32.totalorder %s4248_s23, %s3421_s30  ;;  %p3429_p4 = scmp.lt.s32.totalorder %s4248_s23, %s4248_s23 }
  0x77   : > { %p3430_p10 = scmp.lt.s32.totalorder %s3428_s28, %s3421_s30 }
  0x78   : > { %p3424_p7 = pnand %p3422_p5, %p4258_p8 }
  0x79   : > { %p3431_p11 = por %p3430_p10, %p3429_p4 }
  0x7a   : > { %p3425_p9 = pneg %p3424_p7 }
  0x7c   : > { %p3432_p12 = pnand %p3431_p11, %p3425_p9 }
  0x7e   : > { %3435 = shalt.err (!%p3432_p12)
}
  0x7f   : > { %3139 = dma.hbm_to_vmem [thread:$0]  (!%p4242_p6), %s5173_s7, 16, %s4248_s23, [#allocation15]  }
  0x80   : > { %s4059_s12 = smov [#allocation17]   ;;  %s4060_s21 = smov [#allocation20]  }
  0x81   : > { %s618_s14 = sshll.u32 %s4059_s12, 4  ;;  %s642_s1 = sshll.u32 %s4060_s21, 4  ;;  %s619_s14 = int_to_ptr.vmem [resolvable:$true] %s618_s14  ;;  %s643_s1 = int_to_ptr.vmem [resolvable:$true] %s642_s1 }
  0x82   : > { %s5174_s9 = sld [smem:[#allocation61_spill]] }
  0x88   : > { %s3436_s20 = scalar_lea.hbm %s5174_s9, 256 }
  0x89   : > { %p3437_p13 = scmp.ne.s32.totalorder %s5174_s9, %s3436_s20  ;;  %p3443_p5 = scmp.lt.u32.totalorder %s3436_s20, %s5174_s9 }
  0x8b   : > { %p3439_p0 = pnand %p3437_p13, %p4258_p8 }
  0x8d   : > { %p3440_p2 = pneg %p3439_p0 }
  0x8f   : > { %p3445_p7 = pnand %p3443_p5, %p3440_p2 }
  0x91   : > { %3448 = shalt.err (!%p3445_p7)
}
  0x92   : > { %s3449_s23 = scalar_lea.vmem %s619_s14, 256  ;;  %p3457_p11 = scmp.lt.s32.totalorder %s619_s14, %s619_s14 }
  0x93   : > { %p3450_p9 = scmp.ne.s32.totalorder %s619_s14, %s3449_s23  ;;  %p3458_p12 = scmp.lt.s32.totalorder %s3449_s23, %s3449_s23 }
  0x95   : > { %p3452_p4 = pnand %p3450_p9, %p4258_p8  ;;  %p3459_p1 = por %p3458_p12, %p3457_p11 }
  0x97   : > { %p3453_p10 = pneg %p3452_p4 }
  0x99   : > { %p3460_p3 = pnand %p3459_p1, %p3453_p10 }
  0x9b   : > { %3463 = shalt.err (!%p3460_p3)
}
  0x9c   : > { %s5175_s10 = smov 64   ;;  %s5176_s11 = sld [smem:[#allocation63_spill]] }
  0x9d   : > { %3145 = dma.hbm_to_vmem [thread:$0]  (!%p4242_p6), %s5174_s9, 256, %s619_s14, [#allocation18], %s5175_s10, %s5175_s10, %s4058_s18  }
  0xa2   : > { %s3464_s22 = scalar_lea.hbm %s5176_s11, 256 }
  0xa3   : > { %p3465_p1 = scmp.ne.s32.totalorder %s5176_s11, %s3464_s22  ;;  %p3471_p0 = scmp.lt.u32.totalorder %s3464_s22, %s5176_s11 }
  0xa5   : > { %p3467_p3 = pnand %p3465_p1, %p4258_p8 }
  0xa7   : > { %p3468_p13 = pneg %p3467_p3 }
  0xa9   : > { %p3473_p2 = pnand %p3471_p0, %p3468_p13 }
  0xab   : > { %3476 = shalt.err (!%p3473_p2)
}
  0xac   : > { %s3477_s23 = scalar_lea.vmem %s643_s1, 256  ;;  %p3485_p4 = scmp.lt.s32.totalorder %s643_s1, %s643_s1 }
  0xad   : > { %p3478_p5 = scmp.ne.s32.totalorder %s643_s1, %s3477_s23  ;;  %p3486_p10 = scmp.lt.s32.totalorder %s3477_s23, %s3477_s23 }
  0xaf   : > { %p3480_p7 = pnand %p3478_p5, %p4258_p8  ;;  %p3487_p11 = por %p3486_p10, %p3485_p4 }
  0xb1   : > { %p3481_p9 = pneg %p3480_p7 }
  0xb3   : > { %p3488_p12 = pnand %p3487_p11, %p3481_p9 }
  0xb5   : > { %3491 = shalt.err (!%p3488_p12)
}
  0xb6   : > { %3151 = dma.hbm_to_vmem [thread:$0]  (!%p4242_p6), %s5176_s11, 256, %s643_s1, [#allocation21], %s5175_s10, %s5175_s10, %s4058_s18  }
  0xb7   : > { %s4061_s12 = smov [#allocation23]   ;;  %s4062_s24 = smov [#allocation26]  }
  0xb8   : > { %s667_s21 = sshll.u32 %s4061_s12, 4  ;;  %s688_s22 = sshll.u32 %s4062_s24, 4  ;;  %s668_s21 = int_to_ptr.vmem [resolvable:$true] %s667_s21  ;;  %s689_s22 = int_to_ptr.vmem [resolvable:$true] %s688_s22 }
  0xb9   : > { %s5177_s13 = sld [smem:[#allocation65_spill]] }
  0xbf   : > { %s3492_s28 = scalar_lea.hbm %s5177_s13, 16 }
  0xc0   : > { %p3493_p1 = scmp.ne.s32.totalorder %s5177_s13, %s3492_s28  ;;  %p3499_p0 = scmp.lt.u32.totalorder %s3492_s28, %s5177_s13 }
  0xc2   : > { %p3495_p3 = pnand %p3493_p1, %p4258_p8 }
  0xc4   : > { %p3496_p13 = pneg %p3495_p3 }
  0xc6   : > { %p3501_p2 = pnand %p3499_p0, %p3496_p13 }
  0xc8   : > { %3504 = shalt.err (!%p3501_p2)
}
  0xc9   : > { %s3505_s1 = scalar_lea.vmem %s668_s21, 16  ;;  %s3512_s0 = scalar_lea.vmem %s668_s21, 32 }
  0xca   : > { %p3506_p5 = scmp.ne.s32.totalorder %s668_s21, %s3505_s1  ;;  %p3513_p4 = scmp.lt.s32.totalorder %s668_s21, %s668_s21 }
  0xcb   : > { %p3514_p10 = scmp.lt.s32.totalorder %s3512_s0, %s3505_s1 }
  0xcc   : > { %p3508_p7 = pnand %p3506_p5, %p4258_p8 }
  0xcd   : > { %p3515_p11 = por %p3514_p10, %p3513_p4 }
  0xce   : > { %p3509_p9 = pneg %p3508_p7 }
  0xd0   : > { %p3516_p12 = pnand %p3515_p11, %p3509_p9 }
  0xd2   : > { %3519 = shalt.err (!%p3516_p12)
}
  0xd3   : > { %3157 = dma.hbm_to_vmem [thread:$0]  (!%p4242_p6), %s5177_s13, 16, %s668_s21, [#allocation24]  }
  0xd4   : > { %s5178_s15 = sld [smem:[#allocation67_spill]] }
  0xda   : > { %s3520_s30 = scalar_lea.hbm %s5178_s15, 256 }
  0xdb   : > { %p3521_p1 = scmp.ne.s32.totalorder %s5178_s15, %s3520_s30  ;;  %p3527_p0 = scmp.lt.u32.totalorder %s3520_s30, %s5178_s15 }
  0xdd   : > { %p3523_p3 = pnand %p3521_p1, %p4258_p8 }
  0xdf   : > { %p3524_p13 = pneg %p3523_p3 }
  0xe1   : > { %p3529_p2 = pnand %p3527_p0, %p3524_p13 }
  0xe3   : > { %3532 = shalt.err (!%p3529_p2)
}
  0xe4   : > { %s3533_s1 = scalar_lea.vmem %s689_s22, 256  ;;  %p3541_p4 = scmp.lt.s32.totalorder %s689_s22, %s689_s22 }
  0xe5   : > { %p3534_p5 = scmp.ne.s32.totalorder %s689_s22, %s3533_s1  ;;  %p3542_p10 = scmp.lt.s32.totalorder %s3533_s1, %s3533_s1 }
  0xe7   : > { %p3536_p7 = pnand %p3534_p5, %p4258_p8  ;;  %p3543_p11 = por %p3542_p10, %p3541_p4 }
  0xe9   : > { %p3537_p9 = pneg %p3536_p7 }
  0xeb   : > { %p3544_p12 = pnand %p3543_p11, %p3537_p9 }
  0xed   : > { %3547 = shalt.err (!%p3544_p12)
}
  0xee   : > { %3163 = dma.hbm_to_vmem [thread:$0]  (!%p4242_p6), %s5178_s15, 256, %s689_s22, [#allocation27], %s5175_s10, %s5175_s10, %s4058_s18  }
  0xef   : > { %s4063_s12 = smov [#allocation29]   ;;  %s4064_s3 = smov [#allocation32]  }
  0xf0   : > { %s712_s24 = sshll.u32 %s4063_s12, 4  ;;  %s737_s20 = sshll.u32 %s4064_s3, 4  ;;  %s713_s24 = int_to_ptr.vmem [resolvable:$true] %s712_s24  ;;  %s738_s20 = int_to_ptr.vmem [resolvable:$true] %s737_s20 }
  0xf1   : > { %s5179_s17 = sld [smem:[#allocation69_spill]] }
  0xf7   : > { %s3548_s8 = scalar_lea.hbm %s5179_s17, 512 }
  0xf8   : > { %p3549_p1 = scmp.ne.s32.totalorder %s5179_s17, %s3548_s8  ;;  %p3555_p0 = scmp.lt.u32.totalorder %s3548_s8, %s5179_s17 }
  0xfa   : > { %p3551_p3 = pnand %p3549_p1, %p4258_p8 }
  0xfc   : > { %p3552_p13 = pneg %p3551_p3 }
  0xfe   : > { %p3557_p2 = pnand %p3555_p0, %p3552_p13 }
 0x100   : > { %3560 = shalt.err (!%p3557_p2)
}
 0x101   : > { %s3561_s22 = scalar_lea.vmem %s713_s24, 512  ;;  %p3569_p4 = scmp.lt.s32.totalorder %s713_s24, %s713_s24 }
 0x102   : > { %p3562_p5 = scmp.ne.s32.totalorder %s713_s24, %s3561_s22  ;;  %p3570_p10 = scmp.lt.s32.totalorder %s3561_s22, %s3561_s22 }
 0x104   : > { %p3564_p7 = pnand %p3562_p5, %p4258_p8  ;;  %p3571_p11 = por %p3570_p10, %p3569_p4 }
 0x106   : > { %p3565_p9 = pneg %p3564_p7 }
 0x108   : > { %p3572_p12 = pnand %p3571_p11, %p3565_p9 }
 0x10a   : > { %3575 = shalt.err (!%p3572_p12)
}
 0x10b   : > { %3169 = dma.hbm_to_vmem [thread:$0]  (!%p4242_p6), %s5179_s17, 512, %s713_s24, [#allocation30], %s5175_s10, %s5175_s10, %s4058_s18  }
 0x10c   : > { %s5180_s19 = sld [smem:[#allocation71_spill]] }
 0x112   : > { %s3576_s28 = scalar_lea.hbm %s5180_s19, 16 }
 0x113   : > { %p3577_p1 = scmp.ne.s32.totalorder %s5180_s19, %s3576_s28  ;;  %p3583_p0 = scmp.lt.u32.totalorder %s3576_s28, %s5180_s19 }
 0x115   : > { %p3579_p3 = pnand %p3577_p1, %p4258_p8 }
 0x117   : > { %p3580_p13 = pneg %p3579_p3 }
 0x119   : > { %p3585_p2 = pnand %p3583_p0, %p3580_p13 }
 0x11b   : > { %3588 = shalt.err (!%p3585_p2)
}
 0x11c   : > { %s3589_s21 = scalar_lea.vmem %s738_s20, 16  ;;  %s3596_s18 = scalar_lea.vmem %s738_s20, 32 }
 0x11d   : > { %p3590_p5 = scmp.ne.s32.totalorder %s738_s20, %s3589_s21  ;;  %p3597_p4 = scmp.lt.s32.totalorder %s738_s20, %s738_s20 }
 0x11e   : > { %p3598_p10 = scmp.lt.s32.totalorder %s3596_s18, %s3589_s21 }
 0x11f   : > { %p3592_p7 = pnand %p3590_p5, %p4258_p8 }
 0x120   : > { %p3599_p11 = por %p3598_p10, %p3597_p4 }
 0x121   : > { %p3593_p9 = pneg %p3592_p7 }
 0x123   : > { %p3600_p12 = pnand %p3599_p11, %p3593_p9 }
 0x125   : > { %3603 = shalt.err (!%p3600_p12)
}
 0x126   : > { %3175 = dma.hbm_to_vmem [thread:$0]  (!%p4242_p6), %s5180_s19, 16, %s738_s20, [#allocation33]  }
 0x127   : > { %s2742_s22 = sadd.s32 4294967294, %s4052_s27   ;;  %s4454_s0 = sadd.s32 1, %s4052_s27  }
 0x128   : > { %5181 = sst [smem:[#allocation50_spill]] %s4454_s0  ;;  %s56_s12 = sadd.s32 1, %s4048_s26 }
 0x129   : > { %s53_s3 = ssub.s32 %s4052_s27, %s4454_s0  ;;  %p63_p1 = scmp.ne.s32.totalorder %s4048_s26, %s4044_s25 }
 0x12a   : > { %p54_p3 = scmp.eq.s32.totalorder %s53_s3, 0  ;;  %p64_p13 = scmp.eq.s32.totalorder %s4052_s27, 0 }
 0x12b   : > { %p69_p0 = scmp.ne.s32.totalorder %s4044_s25, %s4040_s2  ;;  %p523_p2 = scmp.eq.s32.totalorder %s4226_s29, 1 }
 0x12c   : > { %s4466_s30 = scalar_select %p54_p3, %s4048_s26, %s56_s12  }
 0x12d   : > { %p65_p5 = por %p64_p13, %p63_p1  ;;  %p5183_p7 = scmp.eq.s32.totalorder %s4226_s29, 0 }
 0x12e   : > { %5182 = sst [smem:[#allocation51_spill]] %s4466_s30  ;;  %p4474_p4 = por %p523_p2, %p63_p1 }
 0x12f   : > { %p4470_p9 = por %p5183_p7, %p69_p0  ;;  %p529_p10 = scmp.eq.s32.totalorder %s2742_s22, 1 }
 0x130   : > { %s5185_s28 = scalar_select %p4474_p4, 1, 0 }
 0x131   : > { %s5184_s20 = scalar_select %p4470_p9, 1, 0 }
 0x132   : > { %p3211_p11 = scmp.lt.s32.totalorder %s4052_s27, 2  ;;  %s4480_s8 = sand.u32 1, %s4048_s26  }
 0x133   : > { %p4482_p12 = por %p529_p10, %p69_p0  ;;  %s777_s14 = sand.u32 1, %s4052_s27  }
 0x134   : > { %p4487_p3 = pnand %p3211_p11, %p65_p5  ;;  %s5123_s21 = sshll.u32 %s4480_s8, 1 }
 0x135   : > { %s5186_s23 = scalar_select %p4482_p12, 1, 0 }
 0x136   : > { %s5187_s1 = scalar_select %p4487_p3, 1, 0 }
 0x137   : > { %s5124_s18 = sshll.u32 %s4052_s27, 5  ;;  %s5188_s22 = sld [smem:[#allocation53_spill]] }
 0x138   : > { %s781_s3 = scalar_lea.vmem [#allocation5], %s5123_s21  ;;  %s4504_s9 = scalar_lea.sflag [#allocation6], %s777_s14 }
 0x139   : > { %s788_s7 = sshll.u32 %s781_s3, 4  ;;  %p4510_p13 = pneg %p4487_p3  ;;  %s4502_s7 = int_to_ptr.vmem [resolvable:$true] %s788_s7 }
 0x13b   : > { %s5189_s13 = scalar_select %p4510_p13, 1, 0 }
 0x13d   : > { %s4498_s12 = scalar_lea.hbm %s5188_s22, %s5124_s18  ;;  %s3609_s21 = scalar_lea.hbm %s5188_s22, 64 }
 0x13e   : > { %s3604_s11 = scalar_lea.hbm %s4498_s12, 32  ;;  %p3610_p5 = scmp.lt.u32.totalorder %s4498_s12, %s5188_s22 }
 0x13f   : > { %p3605_p1 = scmp.ne.s32.totalorder %s4498_s12, %s3604_s11  ;;  %p3611_p7 = scmp.lt.u32.totalorder %s3609_s21, %s3604_s11 }
 0x140   : > { %p3613_p11 = scmp.lt.u32.totalorder %s3604_s11, %s4498_s12 }
 0x141   : > { %p3607_p0 = pnand %p4510_p13, %p3605_p1  ;;  %p3612_p10 = por %p3611_p7, %p3610_p5 }
 0x143   : > { %p3608_p2 = pneg %p3607_p0  ;;  %p3614_p12 = por %p3613_p11, %p3612_p10 }
 0x145   : > { %p3615_p4 = pnand %p3614_p12, %p3608_p2 }
 0x147   : > { %3618 = shalt.err (!%p3615_p4)
}
 0x148   : > { %s3619_s14 = scalar_lea.vmem %s4502_s7, 32  ;;  %s4065_s10 = smov [#allocation5]  }
 0x149   : > { %p3620_p1 = scmp.ne.s32.totalorder %s4502_s7, %s3619_s14  ;;  %s3624_s24 = sshll.u32 %s4065_s10, 4  ;;  %s3625_s24 = int_to_ptr.vmem [resolvable:$false] %s3624_s24 }
 0x14a   : > { %s3626_s18 = scalar_lea.vmem %s3625_s24, 64  ;;  %p3627_p6 = scmp.lt.s32.totalorder %s4502_s7, %s3625_s24 }
 0x14b   : > { %p3622_p0 = pnand %p3620_p1, %p4510_p13  ;;  %p3628_p8 = scmp.lt.s32.totalorder %s3626_s18, %s3619_s14 }
 0x14d   : > { %p3623_p9 = pneg %p3622_p0  ;;  %p3629_p5 = por %p3628_p8, %p3627_p6 }
 0x14f   : > { %p3630_p7 = pnand %p3629_p5, %p3623_p9 }
 0x151   : > { %3633 = shalt.err (!%p3630_p7)
}
 0x152   : > { %3185 = dma.hbm_to_vmem [thread:$0]  (!%p4487_p3), %s4498_s12, 32, %s4502_s7, %s4504_s9  }
 0x153   : > { %s5190_s11 = sshll.u32 %s4052_s27, 5  ;;  %s5191_s15 = sld [smem:[#allocation54_spill]] }
 0x154   : > { %s4066_s16 = smov [#allocation10]   ;;  %s4067_s14 = smov [#allocation13]  }
 0x155   : > { %s562_s24 = sshll.u32 %s4066_s16, 4  ;;  %s586_s18 = sshll.u32 %s4067_s14, 4  ;;  %s563_s24 = int_to_ptr.vmem [resolvable:$true] %s562_s24  ;;  %s587_s18 = int_to_ptr.vmem [resolvable:$true] %s586_s18 }
 0x156   : > { %s5192_s22 = sld [smem:[#allocation56_spill]]  ;;  %p5193_p8 = scmp.ne.s32.totalorder %s5171_s4, 0 }
 0x159   : > { %s4539_s10 = scalar_lea.hbm %s5191_s15, %s5190_s11 }
 0x15c   : > { %s3634_s30 = scalar_lea.hbm %s5192_s22, 16 }
 0x15d   : > { %p3635_p6 = scmp.ne.s32.totalorder %s5192_s22, %s3634_s30  ;;  %p3641_p12 = scmp.lt.u32.totalorder %s3634_s30, %s5192_s22 }
 0x15f   : > { %p3637_p9 = pnand %p3635_p6, %p5193_p8 }
 0x161   : > { %p3638_p4 = pneg %p3637_p9 }
 0x163   : > { %p3643_p2 = pnand %p3641_p12, %p3638_p4 }
 0x165   : > { %3646 = shalt.err (!%p3643_p2)
}
 0x166   : > { %s3647_s16 = scalar_lea.vmem %s563_s24, 16  ;;  %s3654_s17 = scalar_lea.vmem %s563_s24, 32 }
 0x167   : > { %p3648_p10 = scmp.ne.s32.totalorder %s563_s24, %s3647_s16  ;;  %p3655_p0 = scmp.lt.s32.totalorder %s563_s24, %s563_s24 }
 0x168   : > { %p3656_p5 = scmp.lt.s32.totalorder %s3654_s17, %s3647_s16 }
 0x169   : > { %p3650_p11 = pnand %p3648_p10, %p5193_p8 }
 0x16a   : > { %p3657_p7 = por %p3656_p5, %p3655_p0 }
 0x16b   : > { %p3651_p1 = pneg %p3650_p11 }
 0x16d   : > { %p3658_p3 = pnand %p3657_p7, %p3651_p1 }
 0x16f   : > { %3661 = shalt.err (!%p3658_p3)
}
 0x170   : > { %p5194_p6 = scmp.ne.s32.totalorder %s5169_s5, 0  ;;  %s5195_s6 = sld [smem:[#allocation58_spill]] }
 0x172   : > { %3130 = dma.hbm_to_vmem [thread:$0]  (!%p5194_p6), %s5192_s22, 16, %s563_s24, [#allocation9]  }
 0x176   : > { %s3662_s11 = scalar_lea.hbm %s5195_s6, 16 }
 0x177   : > { %p3663_p9 = scmp.ne.s32.totalorder %s5195_s6, %s3662_s11  ;;  %p3669_p3 = scmp.lt.u32.totalorder %s3662_s11, %s5195_s6 }
 0x179   : > { %p3665_p4 = pnand %p3663_p9, %p5193_p8 }
 0x17b   : > { %p3666_p12 = pneg %p3665_p4 }
 0x17d   : > { %p3671_p2 = pnand %p3669_p3, %p3666_p12 }
 0x17f   : > { %3674 = shalt.err (!%p3671_p2)
}
 0x180   : > { %s3675_s12 = scalar_lea.vmem %s587_s18, 16  ;;  %s3682_s24 = scalar_lea.vmem %s587_s18, 32 }
 0x181   : > { %p3676_p10 = scmp.ne.s32.totalorder %s587_s18, %s3675_s12  ;;  %p3683_p0 = scmp.lt.s32.totalorder %s587_s18, %s587_s18 }
 0x182   : > { %p3684_p5 = scmp.lt.s32.totalorder %s3682_s24, %s3675_s12 }
 0x183   : > { %p3678_p11 = pnand %p3676_p10, %p5193_p8 }
 0x184   : > { %p3685_p7 = por %p3684_p5, %p3683_p0 }
 0x185   : > { %p3679_p1 = pneg %p3678_p11 }
 0x187   : > { %p3686_p13 = pnand %p3685_p7, %p3679_p1 }
 0x189   : > { %3689 = shalt.err (!%p3686_p13)
}
 0x18a   : > { %3136 = dma.hbm_to_vmem [thread:$0]  (!%p5194_p6), %s5195_s6, 16, %s587_s18, [#allocation12]  }
 0x18b   : > { %s4068_s19 = smov [#allocation16]   ;;  %s4069_s0 = smov [#allocation19]  }
 0x18c   : > { %s608_s26 = sshll.u32 %s4068_s19, 4  ;;  %s632_s30 = sshll.u32 %s4069_s0, 4  ;;  %s609_s26 = int_to_ptr.vmem [resolvable:$true] %s608_s26  ;;  %s633_s30 = int_to_ptr.vmem [resolvable:$true] %s632_s30 }
 0x18d   : > { %s5196_s3 = sld [smem:[#allocation60_spill]] }
 0x193   : > { %s3690_s14 = scalar_lea.hbm %s5196_s3, 16 }
 0x194   : > { %p3691_p13 = scmp.ne.s32.totalorder %s5196_s3, %s3690_s14  ;;  %p3697_p12 = scmp.lt.u32.totalorder %s3690_s14, %s5196_s3 }
 0x196   : > { %p3693_p9 = pnand %p3691_p13, %p5193_p8 }
 0x198   : > { %p3694_p4 = pneg %p3693_p9 }
 0x19a   : > { %p3699_p3 = pnand %p3697_p12, %p3694_p4 }
 0x19c   : > { %3702 = shalt.err (!%p3699_p3)
}
 0x19d   : > { %s3703_s18 = scalar_lea.vmem %s609_s26, 16  ;;  %s3710_s17 = scalar_lea.vmem %s609_s26, 32 }
 0x19e   : > { %p3704_p2 = scmp.ne.s32.totalorder %s609_s26, %s3703_s18  ;;  %p3711_p1 = scmp.lt.s32.totalorder %s609_s26, %s609_s26 }
 0x19f   : > { %p3712_p0 = scmp.lt.s32.totalorder %s3710_s17, %s3703_s18 }
 0x1a0   : > { %p3706_p10 = pnand %p3704_p2, %p5193_p8 }
 0x1a1   : > { %p3713_p5 = por %p3712_p0, %p3711_p1 }
 0x1a2   : > { %p3707_p11 = pneg %p3706_p10 }
 0x1a4   : > { %p3714_p7 = pnand %p3713_p5, %p3707_p11 }
 0x1a6   : > { %3717 = shalt.err (!%p3714_p7)
}
 0x1a7   : > { %3142 = dma.hbm_to_vmem [thread:$0]  (!%p5194_p6), %s5196_s3, 16, %s609_s26, [#allocation15]  }
 0x1a8   : > { %s5197_s14 = sld [smem:[#allocation62_spill]] }
 0x1ae   : > { %s3718_s7 = scalar_lea.hbm %s5197_s14, 16 }
 0x1af   : > { %p3719_p13 = scmp.ne.s32.totalorder %s5197_s14, %s3718_s7  ;;  %p3725_p12 = scmp.lt.u32.totalorder %s3718_s7, %s5197_s14 }
 0x1b1   : > { %p3721_p9 = pnand %p3719_p13, %p5193_p8 }
 0x1b3   : > { %p3722_p4 = pneg %p3721_p9 }
 0x1b5   : > { %p3727_p3 = pnand %p3725_p12, %p3722_p4 }
 0x1b7   : > { %3730 = shalt.err (!%p3727_p3)
}
 0x1b8   : > { %s3731_s17 = scalar_lea.vmem %s633_s30, 16  ;;  %s3738_s26 = scalar_lea.vmem %s633_s30, 32 }
 0x1b9   : > { %p3732_p2 = scmp.ne.s32.totalorder %s633_s30, %s3731_s17  ;;  %p3739_p1 = scmp.lt.s32.totalorder %s633_s30, %s633_s30 }
 0x1ba   : > { %p3740_p0 = scmp.lt.s32.totalorder %s3738_s26, %s3731_s17 }
 0x1bb   : > { %p3734_p10 = pnand %p3732_p2, %p5193_p8 }
 0x1bc   : > { %p3741_p5 = por %p3740_p0, %p3739_p1 }
 0x1bd   : > { %p3735_p11 = pneg %p3734_p10 }
 0x1bf   : > { %p3742_p7 = pnand %p3741_p5, %p3735_p11 }
 0x1c1   : > { %3745 = shalt.err (!%p3742_p7)
}
 0x1c2   : > { %3148 = dma.hbm_to_vmem [thread:$0]  (!%p5194_p6), %s5197_s14, 16, %s633_s30, [#allocation18]  }
 0x1c3   : > { %s4070_s11 = smov [#allocation22]   ;;  %s4071_s7 = smov [#allocation25]  }
 0x1c4   : > { %s656_s21 = sshll.u32 %s4070_s11, 4  ;;  %s678_s12 = sshll.u32 %s4071_s7, 4  ;;  %s657_s21 = int_to_ptr.vmem [resolvable:$true] %s656_s21  ;;  %s679_s12 = int_to_ptr.vmem [resolvable:$true] %s678_s12 }
 0x1c5   : > { %s5198_s18 = sld [smem:[#allocation64_spill]] }
 0x1cb   : > { %s3746_s3 = scalar_lea.hbm %s5198_s18, 16 }
 0x1cc   : > { %p3747_p13 = scmp.ne.s32.totalorder %s5198_s18, %s3746_s3  ;;  %p3753_p12 = scmp.lt.u32.totalorder %s3746_s3, %s5198_s18 }
 0x1ce   : > { %p3749_p9 = pnand %p3747_p13, %p5193_p8 }
 0x1d0   : > { %p3750_p4 = pneg %p3749_p9 }
 0x1d2   : > { %p3755_p3 = pnand %p3753_p12, %p3750_p4 }
 0x1d4   : > { %3758 = shalt.err (!%p3755_p3)
}
 0x1d5   : > { %s3759_s30 = scalar_lea.vmem %s657_s21, 16  ;;  %s3766_s0 = scalar_lea.vmem %s657_s21, 32 }
 0x1d6   : > { %p3760_p2 = scmp.ne.s32.totalorder %s657_s21, %s3759_s30  ;;  %p3767_p1 = scmp.lt.s32.totalorder %s657_s21, %s657_s21 }
 0x1d7   : > { %p3768_p0 = scmp.lt.s32.totalorder %s3766_s0, %s3759_s30 }
 0x1d8   : > { %p3762_p10 = pnand %p3760_p2, %p5193_p8 }
 0x1d9   : > { %p3769_p5 = por %p3768_p0, %p3767_p1 }
 0x1da   : > { %p3763_p11 = pneg %p3762_p10 }
 0x1dc   : > { %p3770_p7 = pnand %p3769_p5, %p3763_p11 }
 0x1de   : > { %3773 = shalt.err (!%p3770_p7)
}
 0x1df   : > { %3154 = dma.hbm_to_vmem [thread:$0]  (!%p5194_p6), %s5198_s18, 16, %s657_s21, [#allocation21]  }
 0x1e0   : > { %s5199_s24 = sld [smem:[#allocation66_spill]] }
 0x1e6   : > { %s3774_s16 = scalar_lea.hbm %s5199_s24, 16 }
 0x1e7   : > { %p3775_p13 = scmp.ne.s32.totalorder %s5199_s24, %s3774_s16  ;;  %p3781_p12 = scmp.lt.u32.totalorder %s3774_s16, %s5199_s24 }
 0x1e9   : > { %p3777_p9 = pnand %p3775_p13, %p5193_p8 }
 0x1eb   : > { %p3778_p4 = pneg %p3777_p9 }
 0x1ed   : > { %p3783_p3 = pnand %p3781_p12, %p3778_p4 }
 0x1ef   : > { %3786 = shalt.err (!%p3783_p3)
}
 0x1f0   : > { %s3787_s0 = scalar_lea.vmem %s679_s12, 16  ;;  %s3794_s21 = scalar_lea.vmem %s679_s12, 32 }
 0x1f1   : > { %p3788_p2 = scmp.ne.s32.totalorder %s679_s12, %s3787_s0  ;;  %p3795_p1 = scmp.lt.s32.totalorder %s679_s12, %s679_s12 }
 0x1f2   : > { %p3796_p0 = scmp.lt.s32.totalorder %s3794_s21, %s3787_s0 }
 0x1f3   : > { %p3790_p10 = pnand %p3788_p2, %p5193_p8 }
 0x1f4   : > { %p3797_p5 = por %p3796_p0, %p3795_p1 }
 0x1f5   : > { %p3791_p11 = pneg %p3790_p10 }
 0x1f7   : > { %p3798_p7 = pnand %p3797_p5, %p3791_p11 }
 0x1f9   : > { %3801 = shalt.err (!%p3798_p7)
}
 0x1fa   : > { %3160 = dma.hbm_to_vmem [thread:$0]  (!%p5194_p6), %s5199_s24, 16, %s679_s12, [#allocation24]  }
 0x1fb   : > { %s4072_s6 = smov [#allocation28]   ;;  %s4073_s16 = smov [#allocation31]  }
 0x1fc   : > { %s702_s3 = sshll.u32 %s4072_s6, 4  ;;  %s726_s17 = sshll.u32 %s4073_s16, 4  ;;  %s703_s3 = int_to_ptr.vmem [resolvable:$true] %s702_s3  ;;  %s727_s17 = int_to_ptr.vmem [resolvable:$true] %s726_s17 }
 0x1fd   : > { %s5200_s30 = sld [smem:[#allocation68_spill]] }
 0x203   : > { %s3802_s14 = scalar_lea.hbm %s5200_s30, 16 }
 0x204   : > { %p3803_p13 = scmp.ne.s32.totalorder %s5200_s30, %s3802_s14  ;;  %p3809_p12 = scmp.lt.u32.totalorder %s3802_s14, %s5200_s30 }
 0x206   : > { %p3805_p9 = pnand %p3803_p13, %p5193_p8 }
 0x208   : > { %p3806_p4 = pneg %p3805_p9 }
 0x20a   : > { %p3811_p3 = pnand %p3809_p12, %p3806_p4 }
 0x20c   : > { %3814 = shalt.err (!%p3811_p3)
}
 0x20d   : > { %s3815_s12 = scalar_lea.vmem %s703_s3, 16  ;;  %s3822_s7 = scalar_lea.vmem %s703_s3, 32 }
 0x20e   : > { %p3816_p2 = scmp.ne.s32.totalorder %s703_s3, %s3815_s12  ;;  %p3823_p1 = scmp.lt.s32.totalorder %s703_s3, %s703_s3 }
 0x20f   : > { %p3824_p0 = scmp.lt.s32.totalorder %s3822_s7, %s3815_s12 }
 0x210   : > { %p3818_p10 = pnand %p3816_p2, %p5193_p8 }
 0x211   : > { %p3825_p5 = por %p3824_p0, %p3823_p1 }
 0x212   : > { %p3819_p11 = pneg %p3818_p10 }
 0x214   : > { %p3826_p7 = pnand %p3825_p5, %p3819_p11 }
 0x216   : > { %3829 = shalt.err (!%p3826_p7)
}
 0x217   : > { %3166 = dma.hbm_to_vmem [thread:$0]  (!%p5194_p6), %s5200_s30, 16, %s703_s3, [#allocation27]  }
 0x218   : > { %s5201_s26 = sld [smem:[#allocation70_spill]] }
 0x21e   : > { %s5202_s19 = smov %s5201_s26  ;;  %s3830_s0 = scalar_lea.hbm %s5201_s26, 16 }
 0x21f   : > { %p3831_p13 = scmp.ne.s32.totalorder %s5202_s19, %s3830_s0  ;;  %p3837_p12 = scmp.lt.u32.totalorder %s3830_s0, %s5202_s19 }
 0x221   : > { %p3833_p9 = pnand %p3831_p13, %p5193_p8 }
 0x223   : > { %p3834_p4 = pneg %p3833_p9 }
 0x225   : > { %p3839_p3 = pnand %p3837_p12, %p3834_p4 }
 0x227   : > { %3842 = shalt.err (!%p3839_p3)
}
 0x228   : > { %s3843_s6 = scalar_lea.vmem %s727_s17, 16  ;;  %s3850_s3 = scalar_lea.vmem %s727_s17, 32 }
 0x229   : > { %p3844_p2 = scmp.ne.s32.totalorder %s727_s17, %s3843_s6  ;;  %p3851_p1 = scmp.lt.s32.totalorder %s727_s17, %s727_s17 }
 0x22a   : > { %p3852_p0 = scmp.lt.s32.totalorder %s3850_s3, %s3843_s6 }
 0x22b   : > { %p3846_p10 = pnand %p3844_p2, %p5193_p8 }
 0x22c   : > { %p3853_p5 = por %p3852_p0, %p3851_p1 }
 0x22d   : > { %p3847_p11 = pneg %p3846_p10 }
 0x22f   : > { %p3854_p7 = pnand %p3853_p5, %p3847_p11 }
 0x231   : > { %3857 = shalt.err (!%p3854_p7)
}
 0x232   : > { %3172 = dma.hbm_to_vmem [thread:$0]  (!%p5194_p6), %s5202_s19, 16, %s727_s17, [#allocation30]  }
 0x233   : > { %s4074_s18 = smov [#allocation34]   ;;  %s2763_s0 = sshll.u32 %s4480_s8, 3 }
 0x234   : > { %s748_s26 = sshll.u32 %s4074_s18, 4  ;;  %s5203_s12 = sld [smem:[#allocation72_spill]]  ;;  %s749_s26 = int_to_ptr.vmem [resolvable:$true] %s748_s26 }
 0x23a   : > { %s3858_s7 = scalar_lea.hbm %s5203_s12, 16 }
 0x23b   : > { %p3859_p13 = scmp.ne.s32.totalorder %s5203_s12, %s3858_s7  ;;  %p3865_p12 = scmp.lt.u32.totalorder %s3858_s7, %s5203_s12 }
 0x23d   : > { %p3861_p9 = pnand %p3859_p13, %p5193_p8 }
 0x23f   : > { %p3862_p4 = pneg %p3861_p9 }
 0x241   : > { %p3867_p3 = pnand %p3865_p12, %p3862_p4 }
 0x243   : > { %3870 = shalt.err (!%p3867_p3)
}
 0x244   : > { %s3871_s17 = scalar_lea.vmem %s749_s26, 16  ;;  %s3878_s14 = scalar_lea.vmem %s749_s26, 32 }
 0x245   : > { %p3872_p2 = scmp.ne.s32.totalorder %s749_s26, %s3871_s17  ;;  %p3879_p1 = scmp.lt.s32.totalorder %s749_s26, %s749_s26 }
 0x246   : > { %p3880_p0 = scmp.lt.s32.totalorder %s3878_s14, %s3871_s17 }
 0x247   : > { %p3874_p10 = pnand %p3872_p2, %p5193_p8 }
 0x248   : > { %p3881_p5 = por %p3880_p0, %p3879_p1 }
 0x249   : > { %p3875_p11 = pneg %p3874_p10 }
 0x24b   : > { %p3882_p7 = pnand %p3881_p5, %p3875_p11 }
 0x24d   : > { %3885 = shalt.err (!%p3882_p7)
}
 0x24e   : > { %3178 = dma.hbm_to_vmem [thread:$0]  (!%p5194_p6), %s5203_s12, 16, %s749_s26, [#allocation33]  }
 0x24f   : > { %s2764_s22 = sshll.u32 %s4052_s27, 7  ;;  %s5204_s7 = sld [smem:[#allocation52_spill]] }
 0x250   : > { %s763_s3 = scalar_lea.vmem [#allocation2], %s2763_s0  ;;  %s5205_s16 = sshll.u32 %s4480_s8, 1 }
 0x251   : > { %s770_s5 = sshll.u32 %s763_s3, 4  ;;  %s4714_s17 = scalar_lea.vmem [#allocation7], %s5205_s16  ;;  %s4710_s5 = int_to_ptr.vmem [resolvable:$true] %s770_s5 }
 0x252   : > { %s806_s14 = sshll.u32 %s4714_s17, 4  ;;  %s760_s26 = scalar_lea.sflag [#allocation3], %s4480_s8  ;;  %s807_s14 = int_to_ptr.vmem [resolvable:$true] %s806_s14 }
 0x253   : > { %p5206_p6 = scmp.ne.s32.totalorder %s5189_s13, 0 }
 0x255   : > { %s4708_s6 = scalar_lea.hbm %s5204_s7, %s2764_s22  ;;  %s3891_s4 = scalar_lea.hbm %s5204_s7, 256 }
 0x256   : > { %s3886_s18 = scalar_lea.hbm %s4708_s6, 128  ;;  %p3892_p4 = scmp.lt.u32.totalorder %s4708_s6, %s5204_s7 }
 0x257   : > { %p3887_p8 = scmp.ne.s32.totalorder %s4708_s6, %s3886_s18  ;;  %p3893_p12 = scmp.lt.u32.totalorder %s3891_s4, %s3886_s18 }
 0x258   : > { %p3895_p2 = scmp.lt.u32.totalorder %s3886_s18, %s4708_s6 }
 0x259   : > { %p3889_p13 = pnand %p3887_p8, %p5206_p6  ;;  %p3894_p3 = por %p3893_p12, %p3892_p4 }
 0x25b   : > { %p3890_p9 = pneg %p3889_p13  ;;  %p3896_p10 = por %p3895_p2, %p3894_p3 }
 0x25d   : > { %p3897_p11 = pnand %p3896_p10, %p3890_p9 }
 0x25f   : > { %3900 = shalt.err (!%p3897_p11)
}
 0x260   : > { %s3901_s8 = scalar_lea.vmem %s4710_s5, 128  ;;  %s4075_s3 = smov [#allocation2]  }
 0x261   : > { %p3902_p1 = scmp.ne.s32.totalorder %s4710_s5, %s3901_s8  ;;  %s3906_s16 = sshll.u32 %s4075_s3, 4  ;;  %s3907_s16 = int_to_ptr.vmem [resolvable:$false] %s3906_s16 }
 0x262   : > { %s3908_s21 = scalar_lea.vmem %s3907_s16, 256  ;;  %p3909_p7 = scmp.lt.s32.totalorder %s4710_s5, %s3907_s16 }
 0x263   : > { %p3904_p0 = pnand %p3902_p1, %p5206_p6  ;;  %p3910_p8 = scmp.lt.s32.totalorder %s3908_s21, %s3901_s8 }
 0x265   : > { %p3905_p5 = pneg %p3904_p0  ;;  %p3911_p13 = por %p3910_p8, %p3909_p7 }
 0x267   : > { %p3912_p4 = pnand %p3911_p13, %p3905_p5 }
 0x269   : > { %3915 = shalt.err (!%p3912_p4)
}
 0x26a   : > { %p5207_p9 = scmp.ne.s32.totalorder %s5187_s1, 0  ;;  %s3916_s18 = scalar_lea.hbm %s4539_s10, 32 }
 0x26b   : > { %p3917_p12 = scmp.ne.s32.totalorder %s4539_s10, %s3916_s18  ;;  %s3921_s11 = scalar_lea.hbm %s5191_s15, 64 }
 0x26c   : > { %3182 = dma.hbm_to_vmem [thread:$0]  (!%p5207_p9), %s4708_s6, 128, %s4710_s5, %s760_s26  }
 0x26d   : > { %p3919_p3 = pnand %p3917_p12, %p5206_p6  ;;  %p3922_p10 = scmp.lt.u32.totalorder %s4539_s10, %s5191_s15 }
 0x26e   : > { %p3923_p11 = scmp.lt.u32.totalorder %s3921_s11, %s3916_s18  ;;  %p3925_p0 = scmp.lt.u32.totalorder %s3916_s18, %s4539_s10 }
 0x26f   : > { %p3920_p2 = pneg %p3919_p3 }
 0x270   : > { %p3924_p1 = por %p3923_p11, %p3922_p10 }
 0x272   : > { %p3926_p5 = por %p3925_p0, %p3924_p1 }
 0x274   : > { %p3927_p7 = pnand %p3926_p5, %p3920_p2 }
 0x276   : > { %3930 = shalt.err (!%p3927_p7)
}
 0x277   : > { %s3931_s6 = scalar_lea.vmem %s807_s14, 32  ;;  %s4076_s5 = smov [#allocation7]  }
 0x278   : > { %p3932_p8 = scmp.ne.s32.totalorder %s807_s14, %s3931_s6  ;;  %s3936_s17 = sshll.u32 %s4076_s5, 4  ;;  %s3937_s17 = int_to_ptr.vmem [resolvable:$false] %s3936_s17 }
 0x279   : > { %s3938_s26 = scalar_lea.vmem %s3937_s17, 64  ;;  %p3939_p12 = scmp.lt.s32.totalorder %s807_s14, %s3937_s17 }
 0x27a   : > { %p3934_p13 = pnand %p3932_p8, %p5206_p6  ;;  %p3940_p3 = scmp.lt.s32.totalorder %s3938_s26, %s3931_s6 }
 0x27c   : > { %p3935_p4 = pneg %p3934_p13  ;;  %p3941_p9 = por %p3940_p3, %p3939_p12 }
 0x27e   : > { %p3942_p10 = pnand %p3941_p9, %p3935_p4 }
 0x280   : > { %3945 = shalt.err (!%p3942_p10)
}
 0x281   : > { %p5208_p11 = scmp.ne.s32.totalorder %s5187_s1, 0  ;;  %s5209_s3 = sld [smem:[#allocation49_spill]] }
 0x283   : > { %3188 = dma.hbm_to_vmem [thread:$0]  (!%p5208_p11), %s4539_s10, 32, %s807_s14, %s4504_s9  }
 0x287   : > { %p5210_p2 = scmp.ne.s32.totalorder %s5209_s3, 0 }
 0x288   : > { %s4762_s13 = sand.u32 (!%p5210_p2), 1, %s4044_s25   ;;  %p5211_p6 = scmp.ne.s32.totalorder (!%p5210_p2), %s5184_s20, 0 }
 0x289   : > { %815 = sbr.rel (%p5210_p2) target bundleno = 4620 (0x120c), region = 104  ;;  %s2770_s16 = sshll.u32 (!%p5210_p2), %s4762_s13, 3 }
 0x28a   : > { %s818_s21 = scalar_lea.sflag (!%p5210_p2), [#allocation3], %s4762_s13  ;;  %s4768_s18 = scalar_lea.vmem (!%p5210_p2), [#allocation2], %s2770_s16 }
 0x290   : > { %3991 = dma.done.wait (%p5211_p6), %s818_s21, 128  }
 0x291   : > { %3993 = vsyncadd (%p5211_p6), %s818_s21, 4294967168  ;;  %s826_s9 = sand.u32 1, %s4226_s29   ;;  %s2771_s1 = sshll.u32 %s4762_s13, 1 }
 0x292   : > { %s827_s10 = scalar_lea.sflag [#allocation6], %s826_s9  ;;  %s4776_s14 = scalar_lea.vmem [#allocation5], %s2771_s1 }
 0x293   : > { %3995 = dma.done.wait (%p5211_p6), %s827_s10, 64  }
 0x294   : > { %3997 = vsyncadd (%p5211_p6), %s827_s10, 4294967232  ;;  %s4782_s22 = scalar_lea.vmem [#allocation7], %s2771_s1  ;;  %p5212_p9 = scmp.eq.s32.totalorder %s4226_s29, 0 }
 0x296   : > { %3999 = dma.done.wait (%p5212_p9), [#allocation9], 272   ;;  %p5213_p1 = pmov %p5212_p9 }
 0x298   : > { %4001 = vsyncadd (%p5213_p1), [#allocation9], 4294967024  ;;  %p5214_p0 = pmov %p5213_p1 }
 0x29a   : > { %4003 = dma.done.wait (%p5214_p0), [#allocation12], 272   ;;  %p5215_p5 = pmov %p5214_p0 }
 0x29b   : > { %p5216_p7 = pmov %p5214_p0 }
 0x29c   : > { %4005 = vsyncadd (%p5215_p5), [#allocation12], 4294967024 }
 0x29d   : > { %4007 = dma.done.wait (%p5216_p7), [#allocation15], 32   ;;  %p5217_p8 = pmov %p5214_p0 }
 0x29e   : > { %p5218_p13 = pmov %p5214_p0 }
 0x29f   : > { %4009 = vsyncadd (%p5217_p8), [#allocation15], 4294967264 }
 0x2a0   : > { %4011 = dma.done.wait (%p5218_p13), [#allocation18], 272   ;;  %p5219_p4 = pmov %p5214_p0 }
 0x2a1   : > { %p5220_p12 = pmov %p5214_p0 }
 0x2a2   : > { %4013 = vsyncadd (%p5219_p4), [#allocation18], 4294967024 }
 0x2a3   : > { %4015 = dma.done.wait (%p5220_p12), [#allocation21], 272   ;;  %p5221_p3 = pmov %p5214_p0 }
 0x2a4   : > { %p5222_p10 = pmov %p5214_p0 }
 0x2a5   : > { %4017 = vsyncadd (%p5221_p3), [#allocation21], 4294967024 }
 0x2a6   : > { %4019 = dma.done.wait (%p5222_p10), [#allocation24], 32   ;;  %p5223_p11 = pmov %p5214_p0 }
 0x2a7   : > { %p5224_p2 = pmov %p5214_p0 }
 0x2a8   : > { %4021 = vsyncadd (%p5223_p11), [#allocation24], 4294967264 }
 0x2a9   : > { %4023 = dma.done.wait (%p5224_p2), [#allocation27], 272   ;;  %p5225_p6 = pmov %p5214_p0 }
 0x2aa   : > { %p5226_p9 = pmov %p5214_p0 }
 0x2ab   : > { %4025 = vsyncadd (%p5225_p6), [#allocation27], 4294967024 }
 0x2ac   : > { %4027 = dma.done.wait (%p5226_p9), [#allocation30], 528   ;;  %p5227_p1 = pmov %p5214_p0 }
 0x2ae   : > { %4029 = vsyncadd (%p5227_p1), [#allocation30], 4294966768 }
 0x2af   : > { %4031 = dma.done.wait (%p5214_p0), [#allocation33], 32   ;;  %p5228_p5 = pmov %p5214_p0 }
 0x2b0   : > { %v4077_v0 = vmov 0.0   ;;  %vm4078_vm0 = vmmov 0   ;;  %v3300_v1 = vld [vmem:[#allocation8] sm:$0xff]   ;;  %v3301_v2 = vld [vmem:[#allocation8 + $0x8] sm:$0xff]   ;;  %vm1023_vm1 = vcmask 261120   ;;  %s4079_s20 = smov 120  }
 0x2b1   : > { %4033 = vsyncadd (%p5228_p5), [#allocation33], 4294967264  ;;  %2896 = vmatprep.subr.bf16.mxu0 %v4077_v0  ;;  %2900 = vmatprep.mubr.msk.bf16.mxu0 %vm4078_vm0, %v4077_v0  ;;  %v4827_v3 = vld [vmem:[%s4768_s18] sm:$0xff]  ;;  %s4080_s4 = smov 96   ;;  %s4081_s11 = smov 80   ;;  %vm1071_vm2 = vcmask 64512  }
 0x2b2   : > { %2904 = vmatprep.subr.bf16.mxu1 %v4077_v0  ;;  %2906 = vmatprep.mubr.msk.bf16.mxu1 %vm4078_vm0, %v4077_v0  ;;  %v1004_v4 = vpack.c.bf16 %v4827_v3, %v4827_v3  ;;  %v2792_v5 = vld [vmem:[#allocation10] ss:$0 sm:$0xff]  ;;  %s4082_s0 = smov 88   ;;  %s4083_s8 = smov 72   ;;  %v982_v23 = vld [vmem:[%s4776_s14] sm:$0x3] }
 0x2b3   : > { %2897 = vmatpush3.bf16.msra.mxu0 %v3300_v1  ;;  %s4084_s6 = smov 112   ;;  %s4085_s5 = smov 104   ;;  %v983_v24 = vunpack.c.0.s8 %v982_v23  ;;  %v4086_v27 = vmov -1e+09   ;;  %vm1137_vm4 = vcmask 1043456   ;;  %vm1530_vm5 = vcmask 130048  }
 0x2b4   : > { %2898 = vmatprep.subr.bf16.mxu0 %v4077_v0  ;;  %s4087_s17 = smov 56   ;;  %s4088_s26 = smov 64   ;;  %vm1532_vm6 = vcmask 195584   ;;  %vm2368_vm8 = vcmask 523264  }
 0x2b5   : > { %v984_v25 = vcvt.s32.f32 %v983_v24  ;;  %s4089_s3 = smov 40   ;;  %s4090_s21 = smov 48  }
 0x2b6   : > { %s4091_s18 = smov 8   ;;  %s4092_s9 = smov 16  }
 0x2b7   : > { %2899 = vmatpush3.bf16.msra.mxu0 %v3301_v2  ;;  %vm985_vm3 = vcmp.gt.f32.partialorder %v984_v25, 0.0  ;;  %s4093_s1 = smov 24   ;;  %s2841_s10 = sshll.u32 %s4226_s29, 7 }
 0x2b8   : > { %2910 = vmatprep.subr.bf16.mxu0 %v4077_v0  ;;  %v986_v28 = vsel %vm985_vm3, 0.0, %v4086_v27  ;;  %s979_s14 = scalar_lea.vmem [#allocation35], %s2770_s16  ;;  %p5230_p8 = scmp.ne.s32.totalorder %s5185_s28, 0 }
 0x2b9   : > { %s4094_s29 = smov [#allocation35]  }
 0x2ba   : > { %2901 = vmatmul.mubr.msk.bf16.vlgmr.msra.gmra.mrb[0].mxu0 %vm1023_vm1, %v1004_v4  ;;  %s3950_s16 = sshll.u32 %s4094_s29, 4  ;;  %s3951_s16 = int_to_ptr.vmem [resolvable:$false] %s3950_s16 }
 0x2bb   : > { %2912 = vmatprep.mubr.msk.bf16.mxu0 %vm4078_vm0, %v4077_v0 }
 0x38d   : > { %v1061_v6 = vpop.f32.mrb[0].mxu0 }
 0x38e   : > { %v1062_v7 = vadd.f32 %v2792_v5, %v1061_v6  ;;  %v2902_v8 = vpop.f32.mrb[1].mxu0 }
 0x38f   : > { %v1064_v9 = vpop.f32.mrb[2].mxu0 }
 0x390   : > { %v4836_v10 = vpack.c.bf16 %v1062_v7, %v1062_v7  ;;  %v2903_v11 = vpop.f32.mrb[3].mxu0 }
 0x392   : > { %1181 = vrot.lane.b32.xlu1 %v4836_v10, %s4079_s20  ;;  %1069 = vrot.lane.b32.xlu0 %v4836_v10, %s4080_s4 }
 0x396   : > { %1295 = vrot.lane.b32.xlu1 %v4836_v10, %s4081_s11  ;;  %1183 = vrot.lane.b32.xlu0 %v4836_v10, %s4082_s0 }
 0x39a   : > { %1407 = vrot.lane.b32.xlu1 %v4836_v10, %s4083_s8  ;;  %1293 = vrot.lane.b32.xlu0 %v4836_v10, %s4084_s6 }
 0x39e   : > { %1405 = vrot.lane.b32.xlu0 %v4836_v10, %s4085_s5 }
 0x404   : > { %v1070_v12 = vpop.permute.xlu0 %1069  ;;  %v1182_v15 = vpop.permute.xlu1 %1181 }
 0x405   : > { %v1076_v13 = vsel %vm1071_vm2, %v1070_v12, 0 }
 0x406   : > { %2905 = vmatpush3.bf16.xpose.msra.mxu1 %v1076_v13 }
 0x407   : > { %2916 = vmatprep.subr.bf16.mxu1 %v4077_v0 }
 0x408   : > { %v1184_v14 = vpop.permute.xlu0 %1183  ;;  %v1296_v17 = vpop.permute.xlu1 %1295 }
 0x409   : > { %v1189_v16 = vsel %vm1071_vm2, %v1184_v14, 0  ;;  %v1301_v18 = vsel %vm1071_vm2, %v1296_v17, 0 }
 0x40c   : > { %v1408_v19 = vpop.permute.xlu1 %1407  ;;  %v1294_v20 = vpop.permute.xlu0 %1293 }
 0x40d   : > { %2907 = vmatmul.mubr.msk.bf16.vlgmr.msra.gmra.mrb[0].mxu1 %vm1071_vm2, %v4836_v10  ;;  %v1413_v21 = vsel %vm1071_vm2, %v1408_v19, 0 }
 0x40e   : > { %2917 = vmatpush3.bf16.xpose.msra.mxu1 %v1189_v16  ;;  %2918 = vmatprep.mubr.msk.bf16.mxu1 %vm4078_vm0, %v4077_v0 }
 0x40f   : > { %2928 = vmatprep.subr.bf16.mxu1 %v4077_v0 }
 0x410   : > { %v1406_v22 = vpop.permute.xlu0 %1405 }
 0x415   : > { %2919 = vmatmul.mubr.msk.bf16.vlgmr.msra.gmra.mrb[4].mxu1 %vm1071_vm2, %v1182_v15 }
 0x416   : > { %2929 = vmatpush3.bf16.xpose.msra.mxu1 %v1301_v18  ;;  %2930 = vmatprep.mubr.msk.bf16.mxu1 %vm4078_vm0, %v4077_v0 }
 0x417   : > { %2940 = vmatprep.subr.bf16.mxu1 %v4077_v0 }
 0x41d   : > { %2931 = vmatmul.mubr.msk.bf16.vlgmr.msra.gmra.mrb[8].mxu1 %vm1071_vm2, %v1294_v20 }
 0x41e   : > { %2941 = vmatpush3.bf16.xpose.msra.mxu1 %v1413_v21  ;;  %2942 = vmatprep.mubr.msk.bf16.mxu1 %vm4078_vm0, %v4077_v0 }
 0x41f   : > { %2952 = vmatprep.subr.bf16.mxu1 %v4077_v0 }
 0x425   : > { %2943 = vmatmul.mubr.msk.bf16.vlgmr.msra.gmra.mrb[12].mxu1 %vm1071_vm2, %v1406_v22 }
 0x426   : > { %2956 = vmatprep.mubr.msk.bf16.mxu1 %vm4078_vm0, %v4077_v0 }
 0x4e0   : > { %v1112_v26 = vpop.f32.mrb[0].mxu1 }
 0x4e1   : > { %v1118_v29 = vmul.f32 0.35355338, %v1112_v26  ;;  %v2908_v30 = vpop.f32.mrb[1].mxu1 }
 0x4e2   : > { %v1115_v31 = vpop.f32.mrb[2].mxu1 }
 0x4e3   : > { %v2909_v32 = vpop.f32.mrb[3].mxu1  ;;  %v1119_v33 = vadd.f32 %v1118_v29, %v986_v28 }
 0x4e5   : > { %v1120_v34 = vsel %vm1071_vm2, %v1119_v33, -inf }
 0x4e6   : > { %1121 = vmax.xlane.f32.xlu1 %v1120_v34 }
 0x4e8   : > { %v1225_v35 = vpop.f32.mrb[4].mxu1 }
 0x4e9   : > { %v1231_v36 = vmul.f32 0.35355338, %v1225_v35  ;;  %v2920_v37 = vpop.f32.mrb[5].mxu1 }
 0x4ea   : > { %v1228_v38 = vpop.f32.mrb[6].mxu1 }
 0x4eb   : > { %v2921_v39 = vpop.f32.mrb[7].mxu1  ;;  %v1232_v40 = vadd.f32 %v1231_v36, %v986_v28 }
 0x4ed   : > { %v1233_v41 = vsel %vm1071_vm2, %v1232_v40, -inf }
 0x4ee   : > { %1234 = vmax.xlane.f32.xlu0 %v1233_v41 }
 0x4f0   : > { %v1337_v42 = vpop.f32.mrb[8].mxu1 }
 0x4f1   : > { %v1343_v43 = vmul.f32 0.35355338, %v1337_v42  ;;  %v2932_v44 = vpop.f32.mrb[9].mxu1 }
 0x4f2   : > { %v1340_v45 = vpop.f32.mrb[10].mxu1 }
 0x4f3   : > { %v2933_v46 = vpop.f32.mrb[11].mxu1  ;;  %v1344_v47 = vadd.f32 %v1343_v43, %v986_v28 }
 0x4f5   : > { %v1345_v48 = vsel %vm1071_vm2, %v1344_v47, -inf }
 0x4f6   : > { %1346 = vmax.xlane.f32.xlu0 %v1345_v48  ;;  %v3303_v48 = vld [vmem:[#allocation11 + $0x8] sm:$0xff]  }
 0x4f8   : > { %v1449_v49 = vpop.f32.mrb[12].mxu1 }
 0x4f9   : > { %v1455_v50 = vmul.f32 0.35355338, %v1449_v49  ;;  %v2944_v51 = vpop.f32.mrb[13].mxu1 }
 0x4fa   : > { %v1452_v52 = vpop.f32.mrb[14].mxu1 }
 0x4fb   : > { %v2945_v53 = vpop.f32.mrb[15].mxu1  ;;  %v1456_v54 = vadd.f32 %v1455_v50, %v986_v28 }
 0x4fd   : > { %v1457_v55 = vsel %vm1071_vm2, %v1456_v54, -inf }
 0x4fe   : > { %1458 = vmax.xlane.f32.xlu1 %v1457_v55 }
 0x573   : > { %v1122_v56 = vpop.xlane.xlu1 %1121 }
 0x574   : > { %v1123_v57 = vsub.f32 %v1119_v33, %v1122_v56 }
 0x576   : > { %v1124_v58 = vmul.f32 1.442695, %v1123_v57 }
 0x578   : > { %3314 = vpow2.f32 %v1124_v58 }
 0x57b   : > { %v1235_v59 = vpop.xlane.xlu0 %1234 }
 0x57c   : > { %v1236_v60 = vsub.f32 %v1232_v40, %v1235_v59 }
 0x57e   : > { %v1237_v61 = vmul.f32 1.442695, %v1236_v60 }
 0x580   : > { %3316 = vpow2.f32 %v1237_v61 }
 0x582   : > { %v3315_v62 = vpop.eup %3314 }
 0x583   : > { %v1347_v63 = vpop.xlane.xlu0 %1346  ;;  %v1126_v1 = vsel %vm1071_vm2, %v3315_v62, 0.0 }
 0x584   : > { %v1348_v2 = vsub.f32 %v1344_v47, %v1347_v63  ;;  %1127 = vadd.xlane.f32.xlu0 %v1126_v1  ;;  %v3302_v47 = vld [vmem:[#allocation11] sm:$0xff]   ;;  %v2804_v1 = vld [vmem:[#allocation13] ss:$0 sm:$0xff] }
 0x585   : > { %2953 = vmatpush3.bf16.msra.mxu1 %v3302_v47 }
 0x586   : > { %v1349_v4 = vmul.f32 1.442695, %v1348_v2  ;;  %2954 = vmatprep.subr.bf16.mxu1 %v4077_v0 }
 0x588   : > { %3318 = vpow2.f32 %v1349_v4 }
 0x589   : > { %2955 = vmatpush3.bf16.msra.mxu1 %v3303_v48  ;;  %v987_v48 = vld [vmem:[%s4782_s22] sm:$0x3]  ;;  %s2458_s22 = sshll.u32 %s979_s14, 4  ;;  %s5038_s22 = int_to_ptr.vmem [resolvable:$true] %s2458_s22 }
 0x58a   : > { %v3317_v5 = vpop.eup %3316  ;;  %2968 = vmatprep.subr.bf16.mxu1 %v4077_v0  ;;  %p3953_p12 = scmp.lt.s32.totalorder %s5038_s22, %s3951_s16 }
 0x58b   : > { %v1239_v6 = vsel %vm1071_vm2, %v3317_v5, 0.0  ;;  %v1459_v9 = vpop.xlane.xlu1 %1458 }
 0x58c   : > { %1240 = vadd.xlane.f32.xlu1 %v1239_v6  ;;  %v1460_v11 = vsub.f32 %v1456_v54, %v1459_v9 }
 0x58e   : > { %v1461_v12 = vmul.f32 1.442695, %v1460_v11 }
 0x590   : > { %3320 = vpow2.f32 %v1461_v12 }
 0x592   : > { %v3319_v7 = vpop.eup %3318 }
 0x593   : > { %v1351_v8 = vsel %vm1071_vm2, %v3319_v7, 0.0 }
 0x594   : > { %1352 = vadd.xlane.f32.xlu0 %v1351_v8 }
 0x59a   : > { %v3321_v13 = vpop.eup %3320 }
 0x59b   : > { %v1463_v14 = vsel %vm1071_vm2, %v3321_v13, 0.0 }
 0x59d   : > { %1245 = vrot.lane.b32.xlu1 %v4836_v10, %s4087_s17 }
 0x5aa   : > { %1132 = vrot.lane.b32.xlu0 %v4836_v10, %s4088_s26 }
 0x5ae   : > { %1469 = vrot.lane.b32.xlu0 %v4836_v10, %s4089_s3 }
 0x5c1   : > { %1464 = vadd.xlane.f32.xlu1 %v1463_v14  ;;  %v3305_v14 = vld [vmem:[#allocation17 + $0x8] sm:$0xff]  }
 0x5d2   : > { %1357 = vrot.lane.b32.xlu1 %v4836_v10, %s4090_s21 }
 0x611   : > { %v1128_v15 = vpop.xlane.xlu0 %1127 }
 0x612   : > { %3322 = vrcp.f32 %v1128_v15 }
 0x619   : > { %v1241_v16 = vpop.xlane.xlu1 %1240 }
 0x61a   : > { %3324 = vrcp.f32 %v1241_v16 }
 0x61c   : > { %v3323_v17 = vpop.eup %3322 }
 0x61d   : > { %v1130_v19 = vmul.f32 %v3323_v17, %v3315_v62  ;;  %v1246_v22 = vpop.permute.xlu1 %1245 }
 0x61e   : > { %v1251_v25 = vsel %vm1137_vm4, %v1246_v22, 0 }
 0x61f   : > { %v1131_v23 = vpack.c.bf16 %v1130_v19, %v1130_v19 }
 0x621   : > { %v1353_v18 = vpop.xlane.xlu0 %1352 }
 0x622   : > { %3326 = vrcp.f32 %v1353_v18 }
 0x624   : > { %v3325_v24 = vpop.eup %3324 }
 0x625   : > { %v1133_v20 = vpop.permute.xlu0 %1132  ;;  %v1243_v10 = vmul.f32 %v3325_v24, %v3317_v5  ;;  %v2808_v24 = vld [vmem:[#allocation14] ss:$0 sm:$0xff] }
 0x626   : > { %v1139_v21 = vsel %vm1137_vm4, %v1133_v20, 0 }
 0x627   : > { %2911 = vmatpush3.bf16.msra.mxu0 %v1139_v21  ;;  %v1244_v26 = vpack.c.bf16 %v1243_v10, %v1243_v10  ;;  %v2809_v10 = vld [vmem:[#allocation16] ss:$0 sm:$0xff] }
 0x628   : > { %2922 = vmatprep.subr.bf16.mxu0 %v4077_v0 }
 0x629   : > { %v1470_v33 = vpop.permute.xlu0 %1469 }
 0x62a   : > { %2913 = vmatmul.mubr.msk.bf16.vlgmr.msra.gmra.mrb[4].mxu0 %vm1071_vm2, %v1131_v23  ;;  %v1475_v35 = vsel %vm1137_vm4, %v1470_v33, 0 }
 0x62b   : > { %2923 = vmatpush3.bf16.msra.mxu0 %v1251_v25  ;;  %2924 = vmatprep.mubr.msk.bf16.mxu0 %vm4078_vm0, %v4077_v0 }
 0x62c   : > { %2934 = vmatprep.subr.bf16.mxu0 %v4077_v0  ;;  %v3327_v28 = vpop.eup %3326 }
 0x62d   : > { %v1355_v30 = vmul.f32 %v3327_v28, %v3319_v7 }
 0x62f   : > { %v1356_v34 = vpack.c.bf16 %v1355_v30, %v1355_v30  ;;  %v2810_v30 = vld [vmem:[#allocation19] ss:$0 sm:$0xff] }
 0x632   : > { %2925 = vmatmul.mubr.msk.bf16.vlgmr.msra.gmra.mrb[8].mxu0 %vm1071_vm2, %v1244_v26 }
 0x633   : > { %2936 = vmatprep.mubr.msk.bf16.mxu0 %vm4078_vm0, %v4077_v0 }
 0x64e   : > { %v1465_v29 = vpop.xlane.xlu1 %1464 }
 0x64f   : > { %3328 = vrcp.f32 %v1465_v29 }
 0x652   : > { %v1358_v31 = vpop.permute.xlu1 %1357 }
 0x653   : > { %v1363_v32 = vsel %vm1137_vm4, %v1358_v31, 0 }
 0x654   : > { %2935 = vmatpush3.bf16.msra.mxu0 %v1363_v32 }
 0x655   : > { %2946 = vmatprep.subr.bf16.mxu0 %v4077_v0 }
 0x657   : > { %2937 = vmatmul.mubr.msk.bf16.vlgmr.msra.gmra.mrb[12].mxu0 %vm1071_vm2, %v1356_v34 }
 0x658   : > { %2947 = vmatpush3.bf16.msra.mxu0 %v1475_v35  ;;  %2948 = vmatprep.mubr.msk.bf16.mxu0 %vm4078_vm0, %v4077_v0 }
 0x659   : > { %v3329_v36 = vpop.eup %3328  ;;  %2960 = vmatprep.subr.bf16.mxu0 %v4077_v0 }
 0x65a   : > { %v1467_v37 = vmul.f32 %v3329_v36, %v3321_v13  ;;  %v3304_v13 = vld [vmem:[#allocation17] sm:$0xff]  }
 0x65c   : > { %v1468_v38 = vpack.c.bf16 %v1467_v37, %v1467_v37 }
 0x65f   : > { %2949 = vmatmul.mubr.msk.bf16.vlgmr.msra.gmra.mrb[16].mxu0 %vm1071_vm2, %v1468_v38 }
 0x660   : > { %2964 = vmatprep.mubr.msk.bf16.mxu0 %vm4078_vm0, %v4077_v0  ;;  %2961 = vmatpush3.bf16.msra.mxu0 %v3304_v13 }
 0x661   : > { %2962 = vmatprep.subr.bf16.mxu0 %v4077_v0 }
 0x664   : > { %2963 = vmatpush3.bf16.msra.mxu0 %v3305_v14 }
 0x665   : > { %2974 = vmatprep.subr.bf16.mxu0 %v4077_v0 }
 0x6fd   : > { %v1175_v39 = vpop.f32.mrb[4].mxu0 }
 0x6fe   : > { %v2914_v40 = vpop.f32.mrb[5].mxu0 }
 0x6ff   : > { %v1178_v41 = vpop.f32.mrb[6].mxu0 }
 0x700   : > { %v2915_v42 = vpop.f32.mrb[7].mxu0 }
 0x705   : > { %v1287_v43 = vpop.f32.mrb[8].mxu0 }
 0x706   : > { %1518 = vrot.lane.b32.xlu1 %v1287_v43, %s4091_s18  ;;  %v2926_v44 = vpop.f32.mrb[9].mxu0 }
 0x707   : > { %v1290_v45 = vpop.f32.mrb[10].mxu0 }
 0x708   : > { %v2927_v46 = vpop.f32.mrb[11].mxu0 }
 0x72a   : > { %v1399_v49 = vpop.f32.mrb[12].mxu0 }
 0x72b   : > { %1522 = vrot.lane.b32.xlu0 %v1399_v49, %s4092_s9  ;;  %v2938_v50 = vpop.f32.mrb[13].mxu0  ;;  %v988_v49 = vunpack.c.0.s8 %v987_v48 }
 0x72c   : > { %v1402_v51 = vpop.f32.mrb[14].mxu0 }
 0x72d   : > { %v2939_v52 = vpop.f32.mrb[15].mxu0  ;;  %v989_v50 = vcvt.s32.f32 %v988_v49 }
 0x72f   : > { %vm990_vm7 = vcmp.gt.f32.partialorder %v989_v50, 0.0 }
 0x730   : > { %v991_v52 = vsel %vm990_vm7, 0.0, %v4086_v27 }
 0x732   : > { %v1511_v53 = vpop.f32.mrb[16].mxu0 }
 0x733   : > { %1526 = vrot.lane.b32.xlu1 %v1511_v53, %s4093_s1  ;;  %v2950_v54 = vpop.f32.mrb[17].mxu0 }
 0x734   : > { %v1514_v55 = vpop.f32.mrb[18].mxu0 }
 0x735   : > { %v2951_v56 = vpop.f32.mrb[19].mxu0 }
 0x778   : > { %v1519_v57 = vpop.permute.xlu1 %1518 }
 0x779   : > { %v1529_v59 = vsel %vm1071_vm2, %v1175_v39, %v1519_v57 }
 0x79d   : > { %v1523_v58 = vpop.permute.xlu0 %1522 }
 0x79e   : > { %v1531_v60 = vsel %vm1530_vm5, %v1529_v59, %v1523_v58 }
 0x7a5   : > { %v1527_v61 = vpop.permute.xlu1 %1526 }
 0x7a6   : > { %v1533_v62 = vsel %vm1532_vm6, %v1531_v60, %v1527_v61 }
 0x7a7   : > { %v1534_v63 = vpack.c.bf16 %v1533_v62, %v1533_v62 }
 0x7a9   : > { %2957 = vmatmul.mubr.msk.bf16.vlgmr.msra.gmra.mrb[16].mxu1 %vm1023_vm1, %v1534_v63 }
 0x7aa   : > { %2970 = vmatprep.mubr.msk.bf16.mxu1 %vm4078_vm0, %v4077_v0 }
 0x87c   : > { %v1590_v2 = vpop.f32.mrb[16].mxu1 }
 0x87d   : > { %v1591_v4 = vadd.f32 %v2804_v1, %v1590_v2  ;;  %v2958_v5 = vpop.f32.mrb[17].mxu1 }
 0x87e   : > { %v1593_v6 = vpop.f32.mrb[18].mxu1 }
 0x87f   : > { %v1596_v7 = vadd.f32 %v1591_v4, %v4827_v3  ;;  %v2959_v8 = vpop.f32.mrb[19].mxu1 }
 0x881   : > { %v1597_v9 = vsel %vm1023_vm1, %v1596_v7, 0.0  ;;  %v1602_v11 = vmul.f32 %v1596_v7, %v1596_v7 }
 0x882   : > { %1598 = vadd.xlane.f32.xlu0 %v1597_v9 }
 0x883   : > { %v1603_v12 = vsel %vm1023_vm1, %v1602_v11, 0.0 }
 0x884   : > { %1604 = vadd.xlane.f32.xlu1 %v1603_v12 }
 0x90f   : > { %v1599_v15 = vpop.xlane.xlu0 %1598 }
 0x910   : > { %v1601_v16 = vmul.f32 0.03125, %v1599_v15 }
 0x911   : > { %v1605_v17 = vpop.xlane.xlu1 %1604 }
 0x912   : > { %v1607_v3 = vmul.f32 %v1601_v16, %v1601_v16  ;;  %v1606_v18 = vmul.f32 0.03125, %v1605_v17  ;;  %v1610_v22 = vsub.f32 %v1596_v7, %v1601_v16 }
 0x914   : > { %v1608_v19 = vsub.f32 %v1606_v18, %v1607_v3 }
 0x916   : > { %v1609_v20 = vmax.f32 %v1608_v19, 0.0 }
 0x918   : > { %v1611_v21 = vadd.f32 1e-05, %v1609_v20 }
 0x91a   : > { %3330 = vrsqrt.f32 %v1611_v21 }
 0x924   : > { %v3331_v23 = vpop.eup %3330 }
 0x925   : > { %v1613_v25 = vmul.f32 %v3331_v23, %v1610_v22 }
 0x927   : > { %v1620_v26 = vmul.f32 %v2808_v24, %v1613_v25 }
 0x929   : > { %v4927_v28 = vadd.f32 %v2809_v10, %v1620_v26 }
 0x92b   : > { %v1640_v29 = vpack.c.bf16 %v4927_v28, %v4927_v28 }
 0x92d   : > { %2965 = vmatmul.mubr.msk.bf16.vlgmr.msra.gmra.mrb[20].mxu0 %vm1023_vm1, %v1640_v29 }
 0x92e   : > { %2976 = vmatprep.mubr.msk.bf16.mxu0 %vm4078_vm0, %v4077_v0 }
 0xa00   : > { %v1696_v31 = vpop.f32.mrb[20].mxu0 }
 0xa01   : > { %v1697_v32 = vadd.f32 %v2810_v30, %v1696_v31  ;;  %v2966_v33 = vpop.f32.mrb[21].mxu0 }
 0xa02   : > { %v1699_v34 = vpop.f32.mrb[22].mxu0 }
 0xa03   : > { %v4934_v35 = vpack.c.bf16 %v1697_v32, %v1697_v32  ;;  %v2967_v36 = vpop.f32.mrb[23].mxu0 }
 0xa05   : > { %1816 = vrot.lane.b32.xlu1 %v4934_v35, %s4082_s0  ;;  %1704 = vrot.lane.b32.xlu0 %v4934_v35, %s4080_s4 }
 0xa09   : > { %1928 = vrot.lane.b32.xlu1 %v4934_v35, %s4081_s11  ;;  %1814 = vrot.lane.b32.xlu0 %v4934_v35, %s4079_s20  ;;  %s5229_s11 = sld [smem:[#allocation73_spill]] }
 0xa0d   : > { %2040 = vrot.lane.b32.xlu1 %v4934_v35, %s4083_s8  ;;  %1926 = vrot.lane.b32.xlu0 %v4934_v35, %s4084_s6  ;;  %s2445_s8 = scalar_lea.sflag [#allocation4], %s4762_s13  ;;  %s3946_s6 = scalar_lea.vmem %s5038_s22, 128 }
 0xa0e   : > { %p3947_p7 = scmp.ne.s32.totalorder %s5038_s22, %s3946_s6 }
 0xa0f   : > { %s5036_s0 = scalar_lea.hbm %s5229_s11, %s2841_s10 }
 0xa10   : > { %p3948_p13 = pnand %p3947_p7, %p5230_p8 }
 0xa11   : > { %2038 = vrot.lane.b32.xlu0 %v4934_v35, %s4085_s5  ;;  %s3952_s5 = scalar_lea.vmem %s3951_s16, 256 }
 0xa12   : > { %p3949_p4 = pneg %p3948_p13  ;;  %p3954_p3 = scmp.lt.s32.totalorder %s3952_s5, %s3946_s6 }
 0xa14   : > { %p3955_p10 = por %p3954_p3, %p3953_p12 }
 0xa16   : > { %p3956_p11 = pnand %p3955_p10, %p3949_p4 }
 0xa77   : > { %v1705_v37 = vpop.permute.xlu0 %1704  ;;  %v1817_v39 = vpop.permute.xlu1 %1816 }
 0xa78   : > { %v1710_v38 = vsel %vm1071_vm2, %v1705_v37, 0  ;;  %v1822_v40 = vsel %vm1071_vm2, %v1817_v39, 0 }
 0xa79   : > { %2969 = vmatpush3.bf16.xpose.msra.mxu1 %v1710_v38 }
 0xa7a   : > { %2980 = vmatprep.subr.bf16.mxu1 %v4077_v0 }
 0xa7b   : > { %v1929_v41 = vpop.permute.xlu1 %1928  ;;  %v1815_v42 = vpop.permute.xlu0 %1814 }
 0xa7c   : > { %v1934_v43 = vsel %vm1071_vm2, %v1929_v41, 0 }
 0xa7f   : > { %v2041_v44 = vpop.permute.xlu1 %2040  ;;  %v1927_v45 = vpop.permute.xlu0 %1926 }
 0xa80   : > { %2971 = vmatmul.mubr.msk.bf16.vlgmr.msra.gmra.mrb[20].mxu1 %vm1071_vm2, %v4934_v35  ;;  %v2046_v46 = vsel %vm1071_vm2, %v2041_v44, 0 }
 0xa81   : > { %2981 = vmatpush3.bf16.xpose.msra.mxu1 %v1822_v40  ;;  %2982 = vmatprep.mubr.msk.bf16.mxu1 %vm4078_vm0, %v4077_v0 }
 0xa82   : > { %2992 = vmatprep.subr.bf16.mxu1 %v4077_v0 }
 0xa83   : > { %v2039_v47 = vpop.permute.xlu0 %2038 }
 0xa88   : > { %2983 = vmatmul.mubr.msk.bf16.vlgmr.msra.gmra.mrb[24].mxu1 %vm1071_vm2, %v1815_v42 }
 0xa89   : > { %2993 = vmatpush3.bf16.xpose.msra.mxu1 %v1934_v43  ;;  %2994 = vmatprep.mubr.msk.bf16.mxu1 %vm4078_vm0, %v4077_v0 }
 0xa8a   : > { %3004 = vmatprep.subr.bf16.mxu1 %v4077_v0 }
 0xa90   : > { %2995 = vmatmul.mubr.msk.bf16.vlgmr.msra.gmra.mrb[28].mxu1 %vm1071_vm2, %v1927_v45 }
 0xa91   : > { %3005 = vmatpush3.bf16.xpose.msra.mxu1 %v2046_v46  ;;  %3006 = vmatprep.mubr.msk.bf16.mxu1 %vm4078_vm0, %v4077_v0 }
 0xa92   : > { %3016 = vmatprep.subr.bf16.mxu1 %v4077_v0 }
 0xa98   : > { %3007 = vmatmul.mubr.msk.bf16.vlgmr.msra.gmra.mrb[32].mxu1 %vm1071_vm2, %v2039_v47 }
 0xa99   : > { %3020 = vmatprep.mubr.msk.bf16.mxu1 %vm4078_vm0, %v4077_v0 }
 0xb53   : > { %v1746_v51 = vpop.f32.mrb[20].mxu1 }
 0xb54   : > { %v1752_v53 = vmul.f32 0.35355338, %v1746_v51  ;;  %v2972_v54 = vpop.f32.mrb[21].mxu1 }
 0xb55   : > { %v1749_v55 = vpop.f32.mrb[22].mxu1 }
 0xb56   : > { %v2973_v56 = vpop.f32.mrb[23].mxu1  ;;  %v1753_v57 = vadd.f32 %v1752_v53, %v991_v52 }
 0xb58   : > { %v1754_v58 = vsel %vm1071_vm2, %v1753_v57, -inf }
 0xb59   : > { %1755 = vmax.xlane.f32.xlu1 %v1754_v58 }
 0xb5b   : > { %v1858_v59 = vpop.f32.mrb[24].mxu1 }
 0xb5c   : > { %v1864_v60 = vmul.f32 0.35355338, %v1858_v59  ;;  %v2984_v61 = vpop.f32.mrb[25].mxu1 }
 0xb5d   : > { %v1861_v62 = vpop.f32.mrb[26].mxu1 }
 0xb5e   : > { %v2985_v63 = vpop.f32.mrb[27].mxu1  ;;  %v1865_v1 = vadd.f32 %v1864_v60, %v991_v52 }
 0xb60   : > { %v1866_v2 = vsel %vm1071_vm2, %v1865_v1, -inf }
 0xb61   : > { %1867 = vmax.xlane.f32.xlu0 %v1866_v2 }
 0xb63   : > { %v1970_v4 = vpop.f32.mrb[28].mxu1 }
 0xb64   : > { %v1976_v5 = vmul.f32 0.35355338, %v1970_v4  ;;  %v2996_v27 = vpop.f32.mrb[29].mxu1 }
 0xb65   : > { %v1973_v6 = vpop.f32.mrb[30].mxu1 }
 0xb66   : > { %v2997_v7 = vpop.f32.mrb[31].mxu1  ;;  %v1977_v8 = vadd.f32 %v1976_v5, %v991_v52 }
 0xb67   : > { %v3306_v7 = vld [vmem:[#allocation20] sm:$0xff]  }
 0xb68   : > { %v1978_v9 = vsel %vm1071_vm2, %v1977_v8, -inf  ;;  %3017 = vmatpush3.bf16.msra.mxu1 %v3306_v7 }
 0xb69   : > { %1979 = vmax.xlane.f32.xlu0 %v1978_v9  ;;  %3018 = vmatprep.subr.bf16.mxu1 %v4077_v0 }
 0xb6b   : > { %v2082_v11 = vpop.f32.mrb[32].mxu1 }
 0xb6c   : > { %v2088_v12 = vmul.f32 0.35355338, %v2082_v11  ;;  %v3008_v13 = vpop.f32.mrb[33].mxu1 }
 0xb6d   : > { %v2085_v14 = vpop.f32.mrb[34].mxu1 }
 0xb6e   : > { %v3009_v15 = vpop.f32.mrb[35].mxu1  ;;  %v2089_v16 = vadd.f32 %v2088_v12, %v991_v52 }
 0xb70   : > { %v2090_v17 = vsel %vm1071_vm2, %v2089_v16, -inf }
 0xb71   : > { %2091 = vmax.xlane.f32.xlu1 %v2090_v17 }
 0xbe6   : > { %v1756_v3 = vpop.xlane.xlu1 %1755 }
 0xbe7   : > { %v1757_v18 = vsub.f32 %v1753_v57, %v1756_v3 }
 0xbe9   : > { %v1758_v19 = vmul.f32 1.442695, %v1757_v18 }
 0xbeb   : > { %3332 = vpow2.f32 %v1758_v19 }
 0xbee   : > { %v1868_v20 = vpop.xlane.xlu0 %1867 }
 0xbef   : > { %v1869_v21 = vsub.f32 %v1865_v1, %v1868_v20 }
 0xbf1   : > { %v1870_v22 = vmul.f32 1.442695, %v1869_v21 }
 0xbf3   : > { %3334 = vpow2.f32 %v1870_v22 }
 0xbf5   : > { %v3333_v23 = vpop.eup %3332 }
 0xbf6   : > { %v1980_v24 = vpop.xlane.xlu0 %1979  ;;  %v1760_v25 = vsel %vm1071_vm2, %v3333_v23, 0.0 }
 0xbf7   : > { %v1981_v10 = vsub.f32 %v1977_v8, %v1980_v24  ;;  %1761 = vadd.xlane.f32.xlu0 %v1760_v25  ;;  %v3307_v8 = vld [vmem:[#allocation20 + $0x8] sm:$0xff]   ;;  %v2822_v24 = vld [vmem:[#allocation22] ss:$0 sm:$0xff] }
 0xbf8   : > { %3019 = vmatpush3.bf16.msra.mxu1 %v3307_v8 }
 0xbf9   : > { %v1982_v26 = vmul.f32 1.442695, %v1981_v10  ;;  %3032 = vmatprep.subr.bf16.mxu1 %v4077_v0 }
 0xbfb   : > { %3336 = vpow2.f32 %v1982_v26 }
 0xbfd   : > { %v3335_v29 = vpop.eup %3334 }
 0xbfe   : > { %v1872_v30 = vsel %vm1071_vm2, %v3335_v29, 0.0  ;;  %v2092_v33 = vpop.xlane.xlu1 %2091 }
 0xbff   : > { %1873 = vadd.xlane.f32.xlu1 %v1872_v30  ;;  %v2093_v34 = vsub.f32 %v2089_v16, %v2092_v33 }
 0xc01   : > { %v2094_v36 = vmul.f32 1.442695, %v2093_v34 }
 0xc03   : > { %3338 = vpow2.f32 %v2094_v36  ;;  %v3308_v36 = vld [vmem:[#allocation26] sm:$0xff]  }
 0xc05   : > { %v3337_v31 = vpop.eup %3336 }
 0xc06   : > { %v1984_v32 = vsel %vm1071_vm2, %v3337_v31, 0.0 }
 0xc07   : > { %1985 = vadd.xlane.f32.xlu0 %v1984_v32 }
 0xc0d   : > { %v3339_v37 = vpop.eup %3338 }
 0xc0e   : > { %v2096_v38 = vsel %vm1071_vm2, %v3339_v37, 0.0 }
 0xc10   : > { %1878 = vrot.lane.b32.xlu1 %v4934_v35, %s4087_s17 }
 0xc1d   : > { %1766 = vrot.lane.b32.xlu0 %v4934_v35, %s4088_s26 }
 0xc21   : > { %2102 = vrot.lane.b32.xlu0 %v4934_v35, %s4089_s3 }
 0xc34   : > { %2097 = vadd.xlane.f32.xlu1 %v2096_v38  ;;  %v3310_v38 = vld [vmem:[#allocation29] sm:$0xff]  }
 0xc45   : > { %1990 = vrot.lane.b32.xlu1 %v4934_v35, %s4090_s21 }
 0xc84   : > { %v1762_v39 = vpop.xlane.xlu0 %1761 }
 0xc85   : > { %3340 = vrcp.f32 %v1762_v39  ;;  %v3311_v39 = vld [vmem:[#allocation29 + $0x8] sm:$0xff]  }
 0xc8c   : > { %v1874_v40 = vpop.xlane.xlu1 %1873 }
 0xc8d   : > { %3342 = vrcp.f32 %v1874_v40 }
 0xc8f   : > { %v3341_v41 = vpop.eup %3340 }
 0xc90   : > { %v1764_v43 = vmul.f32 %v3341_v41, %v3333_v23  ;;  %v1879_v46 = vpop.permute.xlu1 %1878 }
 0xc91   : > { %v1884_v49 = vsel %vm1137_vm4, %v1879_v46, 0 }
 0xc92   : > { %v1765_v47 = vpack.c.bf16 %v1764_v43, %v1764_v43 }
 0xc94   : > { %v1986_v42 = vpop.xlane.xlu0 %1985 }
 0xc95   : > { %3344 = vrcp.f32 %v1986_v42 }
 0xc97   : > { %v3343_v48 = vpop.eup %3342 }
 0xc98   : > { %v1767_v44 = vpop.permute.xlu0 %1766  ;;  %v1876_v35 = vmul.f32 %v3343_v48, %v3335_v29 }
 0xc99   : > { %v1772_v45 = vsel %vm1137_vm4, %v1767_v44, 0 }
 0xc9a   : > { %2975 = vmatpush3.bf16.msra.mxu0 %v1772_v45  ;;  %v1877_v50 = vpack.c.bf16 %v1876_v35, %v1876_v35 }
 0xc9b   : > { %2986 = vmatprep.subr.bf16.mxu0 %v4077_v0 }
 0xc9c   : > { %v2103_v56 = vpop.permute.xlu0 %2102 }
 0xc9d   : > { %2977 = vmatmul.mubr.msk.bf16.vlgmr.msra.gmra.mrb[24].mxu0 %vm1071_vm2, %v1765_v47  ;;  %v2108_v58 = vsel %vm1137_vm4, %v2103_v56, 0  ;;  %v2828_v56 = vld [vmem:[#allocation28] ss:$0 sm:$0xff] }
 0xc9e   : > { %2987 = vmatpush3.bf16.msra.mxu0 %v1884_v49  ;;  %2988 = vmatprep.mubr.msk.bf16.mxu0 %vm4078_vm0, %v4077_v0  ;;  %v2826_v49 = vld [vmem:[#allocation23] ss:$0 sm:$0xff] }
 0xc9f   : > { %2998 = vmatprep.subr.bf16.mxu0 %v4077_v0  ;;  %v3345_v51 = vpop.eup %3344 }
 0xca0   : > { %v1988_v53 = vmul.f32 %v3345_v51, %v3337_v31 }
 0xca2   : > { %v1989_v57 = vpack.c.bf16 %v1988_v53, %v1988_v53 }
 0xca5   : > { %2989 = vmatmul.mubr.msk.bf16.vlgmr.msra.gmra.mrb[28].mxu0 %vm1071_vm2, %v1877_v50  ;;  %v2827_v50 = vld [vmem:[#allocation25] ss:$0 sm:$0xff] }
 0xca6   : > { %3000 = vmatprep.mubr.msk.bf16.mxu0 %vm4078_vm0, %v4077_v0 }
 0xcc1   : > { %v2098_v52 = vpop.xlane.xlu1 %2097 }
 0xcc2   : > { %3346 = vrcp.f32 %v2098_v52 }
 0xcc5   : > { %v1991_v54 = vpop.permute.xlu1 %1990 }
 0xcc6   : > { %v1996_v55 = vsel %vm1137_vm4, %v1991_v54, 0  ;;  %v3312_v54 = vld [vmem:[#allocation29 + $0x10] sm:$0xff]  }
 0xcc7   : > { %2999 = vmatpush3.bf16.msra.mxu0 %v1996_v55  ;;  %v3313_v55 = vld [vmem:[#allocation29 + $0x18] sm:$0xff]  }
 0xcc8   : > { %3010 = vmatprep.subr.bf16.mxu0 %v4077_v0 }
 0xcca   : > { %3001 = vmatmul.mubr.msk.bf16.vlgmr.msra.gmra.mrb[32].mxu0 %vm1071_vm2, %v1989_v57 }
 0xccb   : > { %3011 = vmatpush3.bf16.msra.mxu0 %v2108_v58  ;;  %3012 = vmatprep.mubr.msk.bf16.mxu0 %vm4078_vm0, %v4077_v0 }
 0xccc   : > { %v3347_v59 = vpop.eup %3346  ;;  %3024 = vmatprep.subr.bf16.mxu0 %v4077_v0 }
 0xccd   : > { %v2100_v60 = vmul.f32 %v3347_v59, %v3339_v37  ;;  %v3309_v37 = vld [vmem:[#allocation26 + $0x8] sm:$0xff]  }
 0xccf   : > { %v2101_v61 = vpack.c.bf16 %v2100_v60, %v2100_v60 }
 0xcd2   : > { %3013 = vmatmul.mubr.msk.bf16.vlgmr.msra.gmra.mrb[36].mxu0 %vm1071_vm2, %v2101_v61 }
 0xcd3   : > { %3028 = vmatprep.mubr.msk.bf16.mxu0 %vm4078_vm0, %v4077_v0  ;;  %3025 = vmatpush3.bf16.msra.mxu0 %v3308_v36 }
 0xcd4   : > { %3026 = vmatprep.subr.bf16.mxu0 %v4077_v0 }
 0xcd7   : > { %3027 = vmatpush3.bf16.msra.mxu0 %v3309_v37 }
 0xd70   : > { %v1808_v62 = vpop.f32.mrb[24].mxu0 }
 0xd71   : > { %v2978_v63 = vpop.f32.mrb[25].mxu0 }
 0xd72   : > { %v1811_v1 = vpop.f32.mrb[26].mxu0 }
 0xd73   : > { %v2979_v2 = vpop.f32.mrb[27].mxu0  ;;  %v2832_v1 = vld [vmem:[#allocation31] ss:$0 sm:$0xff] }
 0xd78   : > { %v1920_v4 = vpop.f32.mrb[28].mxu0 }
 0xd79   : > { %2151 = vrot.lane.b32.xlu1 %v1920_v4, %s4091_s18  ;;  %v2990_v5 = vpop.f32.mrb[29].mxu0 }
 0xd7a   : > { %v1923_v27 = vpop.f32.mrb[30].mxu0 }
 0xd7b   : > { %v2991_v6 = vpop.f32.mrb[31].mxu0 }
 0xd9d   : > { %v2032_v9 = vpop.f32.mrb[32].mxu0 }
 0xd9e   : > { %2155 = vrot.lane.b32.xlu0 %v2032_v9, %s4092_s9  ;;  %v3002_v11 = vpop.f32.mrb[33].mxu0 }
 0xd9f   : > { %v2035_v12 = vpop.f32.mrb[34].mxu0 }
 0xda0   : > { %v3003_v13 = vpop.f32.mrb[35].mxu0 }
 0xda5   : > { %v2144_v14 = vpop.f32.mrb[36].mxu0 }
 0xda6   : > { %2159 = vrot.lane.b32.xlu1 %v2144_v14, %s4093_s1  ;;  %v3014_v15 = vpop.f32.mrb[37].mxu0 }
 0xda7   : > { %v2147_v16 = vpop.f32.mrb[38].mxu0 }
 0xda8   : > { %v3015_v17 = vpop.f32.mrb[39].mxu0 }
 0xdeb   : > { %v2152_v3 = vpop.permute.xlu1 %2151 }
 0xdec   : > { %v2162_v19 = vsel %vm1071_vm2, %v1808_v62, %v2152_v3 }
 0xe10   : > { %v2156_v18 = vpop.permute.xlu0 %2155 }
 0xe11   : > { %v2163_v20 = vsel %vm1530_vm5, %v2162_v19, %v2156_v18 }
 0xe18   : > { %v2160_v21 = vpop.permute.xlu1 %2159 }
 0xe19   : > { %v2164_v22 = vsel %vm1532_vm6, %v2163_v20, %v2160_v21  ;;  %v2838_v20 = vld [vmem:[#allocation32] ss:$0 sm:$0xff] }
 0xe1a   : > { %v2165_v23 = vpack.c.bf16 %v2164_v22, %v2164_v22  ;;  %v2839_v22 = vld [vmem:[#allocation34] ss:$0 sm:$0xff] }
 0xe1c   : > { %3021 = vmatmul.mubr.msk.bf16.vlgmr.msra.gmra.mrb[36].mxu1 %vm1023_vm1, %v2165_v23 }
 0xe1d   : > { %3040 = vmatprep.mubr.msk.bf16.mxu1 %vm4078_vm0, %v4077_v0  ;;  %3033 = vmatpush3.bf16.msra.mxu1 %v3310_v38 }
 0xe1e   : > { %3034 = vmatprep.subr.bf16.mxu1 %v4077_v0 }
 0xe21   : > { %3035 = vmatpush3.bf16.msra.mxu1 %v3311_v39 }
 0xe22   : > { %3036 = vmatprep.subr.bf16.mxu1 %v4077_v0 }
 0xe25   : > { %3037 = vmatpush3.bf16.msra.mxu1 %v3312_v54 }
 0xe26   : > { %3038 = vmatprep.subr.bf16.mxu1 %v4077_v0 }
 0xe29   : > { %3039 = vmatpush3.bf16.msra.mxu1 %v3313_v55 }
 0xeef   : > { %v2221_v25 = vpop.f32.mrb[36].mxu1 }
 0xef0   : > { %v2222_v10 = vadd.f32 %v2822_v24, %v2221_v25  ;;  %v3022_v26 = vpop.f32.mrb[37].mxu1 }
 0xef1   : > { %v2224_v29 = vpop.f32.mrb[38].mxu1 }
 0xef2   : > { %v2227_v30 = vadd.f32 %v2222_v10, %v4927_v28  ;;  %v3023_v31 = vpop.f32.mrb[39].mxu1 }
 0xef4   : > { %v2228_v32 = vsel %vm1023_vm1, %v2227_v30, 0.0  ;;  %v2232_v33 = vmul.f32 %v2227_v30, %v2227_v30 }
 0xef5   : > { %2229 = vadd.xlane.f32.xlu0 %v2228_v32 }
 0xef6   : > { %v2233_v34 = vsel %vm1023_vm1, %v2232_v33, 0.0 }
 0xef7   : > { %2234 = vadd.xlane.f32.xlu1 %v2233_v34 }
 0xf82   : > { %v2230_v28 = vpop.xlane.xlu0 %2229 }
 0xf83   : > { %v2231_v40 = vmul.f32 0.03125, %v2230_v28 }
 0xf84   : > { %v2235_v41 = vpop.xlane.xlu1 %2234 }
 0xf85   : > { %v2237_v42 = vmul.f32 %v2231_v40, %v2231_v40  ;;  %v2236_v43 = vmul.f32 0.03125, %v2235_v41  ;;  %v2240_v47 = vsub.f32 %v2227_v30, %v2231_v40 }
 0xf87   : > { %v2238_v44 = vsub.f32 %v2236_v43, %v2237_v42 }
 0xf89   : > { %v2239_v45 = vmax.f32 %v2238_v44, 0.0 }
 0xf8b   : > { %v2241_v46 = vadd.f32 1e-05, %v2239_v45 }
 0xf8d   : > { %3348 = vrsqrt.f32 %v2241_v46 }
 0xf97   : > { %v3349_v48 = vpop.eup %3348 }
 0xf98   : > { %v2243_v35 = vmul.f32 %v3349_v48, %v2240_v47 }
 0xf9a   : > { %v2250_v51 = vmul.f32 %v2826_v49, %v2243_v35 }
 0xf9c   : > { %v2257_v52 = vadd.f32 %v2827_v50, %v2250_v51 }
 0xf9e   : > { %v2274_v53 = vpack.c.bf16 %v2257_v52, %v2257_v52 }
 0xfa0   : > { %3029 = vmatmul.mubr.msk.bf16.vlgmr.msra.gmra.mrb[40].mxu0 %vm1023_vm1, %v2274_v53 }
0x1073   : > { %v2330_v57 = vpop.f32.mrb[40].mxu0 }
0x1074   : > { %v2331_v58 = vadd.f32 %v2828_v56, %v2330_v57  ;;  %v3030_v59 = vpop.f32.mrb[41].mxu0 }
0x1075   : > { %v2333_v60 = vpop.f32.mrb[42].mxu0 }
0x1076   : > { %v2336_v61 = vmax.f32 %v2331_v58, 0.0  ;;  %v3031_v62 = vpop.f32.mrb[43].mxu0 }
0x1078   : > { %v2337_v63 = vpack.c.bf16 %v2336_v61, %v2336_v61 }
0x107a   : > { %3041 = vmatmul.mubr.msk.bf16.vlgmr.msra.gmra.mrb[40].mxu1 %vm2368_vm8, %v2337_v63 }
0x114d   : > { %v2406_v2 = vpop.f32.mrb[40].mxu1 }
0x114e   : > { %v2407_v4 = vadd.f32 %v2832_v1, %v2406_v2  ;;  %v3042_v5 = vpop.f32.mrb[41].mxu1 }
0x114f   : > { %v2409_v27 = vpop.f32.mrb[42].mxu1 }
0x1150   : > { %v2412_v6 = vadd.f32 %v2407_v4, %v2257_v52  ;;  %v3043_v7 = vpop.f32.mrb[43].mxu1 }
0x1152   : > { %v2413_v0 = vsel %vm1023_vm1, %v2412_v6, 0.0  ;;  %v2417_v8 = vmul.f32 %v2412_v6, %v2412_v6 }
0x1153   : > { %2414 = vadd.xlane.f32.xlu0 %v2413_v0 }
0x1154   : > { %v2418_v9 = vsel %vm1023_vm1, %v2417_v8, 0.0 }
0x1157   : > { %2419 = vadd.xlane.f32.xlu0 %v2418_v9 }
0x11e0   : > { %v2415_v11 = vpop.xlane.xlu0 %2414 }
0x11e1   : > { %v2416_v12 = vmul.f32 0.03125, %v2415_v11 }
0x11e3   : > { %v2422_v14 = vmul.f32 %v2416_v12, %v2416_v12  ;;  %v2425_v18 = vsub.f32 %v2412_v6, %v2416_v12 }
0x11e4   : > { %v2420_v13 = vpop.xlane.xlu0 %2419 }
0x11e5   : > { %v2421_v15 = vmul.f32 0.03125, %v2420_v13 }
0x11e7   : > { %v2423_v16 = vsub.f32 %v2421_v15, %v2422_v14 }
0x11e9   : > { %v2424_v17 = vmax.f32 %v2423_v16, 0.0 }
0x11eb   : > { %v2426_v3 = vadd.f32 1e-05, %v2424_v17 }
0x11ed   : > { %3350 = vrsqrt.f32 %v2426_v3 }
0x11f7   : > { %v3351_v19 = vpop.eup %3350 }
0x11f8   : > { %v2428_v21 = vmul.f32 %v3351_v19, %v2425_v18 }
0x11fa   : > { %v2435_v23 = vmul.f32 %v2838_v20, %v2428_v21 }
0x11fc   : > { %v2442_v24 = vadd.f32 %v2839_v22, %v2435_v23 }
0x11fe   : > { %2443 = vst.msk [vmem:[%s979_s14] sm:$0xff] %vm1023_vm1, %v2442_v24 }
0x11ff   : > { %3959 = shalt.err (!%p3956_p11)
}
0x1200   : > { %s3960_s13 = scalar_lea.hbm %s5036_s0, 128  ;;  %s3964_s3 = scalar_lea.hbm %s5229_s11, 256 }
0x1201   : > { %p3961_p2 = scmp.ne.s32.totalorder %s5036_s0, %s3960_s13  ;;  %p3965_p1 = scmp.lt.u32.totalorder %s5036_s0, %s5229_s11 }
0x1202   : > { %p3966_p0 = scmp.lt.u32.totalorder %s3964_s3, %s3960_s13  ;;  %p3968_p7 = scmp.lt.u32.totalorder %s3960_s13, %s5036_s0 }
0x1203   : > { %p3962_p6 = pnand %p3961_p2, %p5230_p8 }
0x1204   : > { %p3967_p5 = por %p3966_p0, %p3965_p1 }
0x1205   : > { %p3963_p9 = pneg %p3962_p6 }
0x1206   : > { %p3969_p13 = por %p3968_p7, %p3967_p5 }
0x1208   : > { %p3970_p4 = pnand %p3969_p13, %p3963_p9 }
0x120a   : > { %3973 = shalt.err (!%p3970_p4)
}
0x120b   : > { %3122 = dma.vmem_to_hbm [thread:$0]  (%p5230_p8), %s5038_s22, 128, %s5036_s0, %s2445_s8  }
0x120c PF: > { %s2470_s9 = sand.u32 1, %s4040_s2   ;;  %p5231_p12 = scmp.ne.s32.totalorder %s5186_s23, 0 }
0x120d   : > { %p5232_p3 = scmp.ge.s32.totalorder %s4052_s27, 2  ;;  %s2471_s1 = scalar_lea.sflag [#allocation4], %s2470_s9 }
0x120f   : > { %p3190_p10 = pnand %p5232_p3, %p5231_p12 }
0x1211   : > { %4035 = dma.done.wait (!%p3190_p10), %s2471_s1, 128  }
0x1212   : > { %4037 = vsyncadd (!%p3190_p10), %s2471_s1, 4294967168  ;;  %s5233_s27 = sld [smem:[#allocation50_spill]]  ;;  %s5234_s10 = sld [smem:[#allocation48_spill]] }
0x1213   : > { %s5235_s26 = sld [smem:[#allocation51_spill]]  ;;  %s5236_s2 = smov %s4044_s25 }
0x1218   : > { %p46_p11 = scmp.ge.s32.totalorder %s5233_s27, 4   ;;  %s5237_s25 = smov %s5234_s10 }
0x121a   :  { %48 = sbr.rel (!%p46_p11) target bundleno = 39 (0x27), region = 245 }
0x1221   :  { %2476 = vsyncpa [#allocation3], 1 }
0x1222   :  { %2478 = vsyncpa [#allocation3 + $0x1], 1 }
0x1223   :  { %2479 = vsyncpa [#allocation6], 1 }
0x1224   :  { %2481 = vsyncpa [#allocation6 + $0x1], 1 }
0x1225   :  { %2482 = vsyncpa [#allocation9], 1 }
0x1226   :  { %2483 = vsyncpa [#allocation12], 1 }
0x1227   :  { %2484 = vsyncpa [#allocation15], 1 }
0x1228   :  { %2485 = vsyncpa [#allocation18], 1 }
0x1229   :  { %2486 = vsyncpa [#allocation21], 1 }
0x122a   :  { %2487 = vsyncpa [#allocation24], 1 }
0x122b   :  { %2488 = vsyncpa [#allocation27], 1 }
0x122c   :  { %2489 = vsyncpa [#allocation30], 1 }
0x122d   :  { %2490 = vsyncpa [#allocation33], 1 }
0x122e   :  { %2491 = vsyncpa [#allocation4], 1 }
0x122f   :  { %2493 = vsyncpa [#allocation4 + $0x1], 1 }

</bundles_post_ra>
